<compile_context>
chip_gen: v7x
topology: tpu7x:2x2x1
jax: 0.10.0
libtpu: 0.0.40
codegen_flags: <defaults>
</compile_context>

<pallas_src>
import jax
import jax.numpy as jnp
from jax.experimental import pallas as pl
from jax.experimental.pallas import tpu as pltpu

ACTION_SIZE = 22
HIDDEN_SIZE = 256
STATE_SIZE = 2 * 11 * 11 + 97          # 339
H2 = 2 * HIDDEN_SIZE                   # 512 (both Q-nets side by side)


# --------------------------------- kernel ------------------------------------

def _critic_kernel(s_ref, a_ref, w1s_ref, w1a_ref, w23_ref, w4_ref, b_ref,
                   out_ref):
    H = HIDDEN_SIZE

    s = s_ref[...].astype(jnp.bfloat16)                       # (tb, 339)
    a = a_ref[...].astype(jnp.bfloat16)                       # (tb, 22)

    # --- fused layer 1 for BOTH Q-nets, split-K (state rows + action rows) ---
    h1 = (jnp.dot(s, w1s_ref[...], preferred_element_type=jnp.float32)
          + jnp.dot(a, w1a_ref[...], preferred_element_type=jnp.float32))
    h1 = jnp.maximum(h1 + b_ref[0:1, :], 0.0)                 # (tb, 512) f32

    h1a = h1[:, :H].astype(jnp.bfloat16)
    h1b = h1[:, H:].astype(jnp.bfloat16)

    # --- layer 2 (stacked weight slab, indices 0/1) ---------------------------
    h2a = jnp.maximum(
        jnp.dot(h1a, w23_ref[0], preferred_element_type=jnp.float32)
        + b_ref[1:2, :H], 0.0)
    h2b = jnp.maximum(
        jnp.dot(h1b, w23_ref[1], preferred_element_type=jnp.float32)
        + b_ref[1:2, H:], 0.0)

    # --- layer 3 (stacked weight slab, indices 2/3) ---------------------------
    h3a = jnp.maximum(
        jnp.dot(h2a.astype(jnp.bfloat16), w23_ref[2],
                preferred_element_type=jnp.float32) + b_ref[2:3, :H], 0.0)
    h3b = jnp.maximum(
        jnp.dot(h2b.astype(jnp.bfloat16), w23_ref[3],
                preferred_element_type=jnp.float32) + b_ref[2:3, H:], 0.0)

    # --- final layers: one MXU matmul against a block-diagonal (512,2) W4 ----
    h3 = jnp.concatenate([h3a.astype(jnp.bfloat16),
                          h3b.astype(jnp.bfloat16)], axis=1)  # (tb, 512)
    q = jnp.dot(h3, w4_ref[...], preferred_element_type=jnp.float32)
    q = q + b_ref[3:4, 0:2]                                   # (tb, 2)

    out_ref[...] = q                                          # single store


# ----------------------------- parameter handling ----------------------------

def _xavier_uniform(key, fan_in, fan_out, gain):
    bound = gain * (6.0 / (fan_in + fan_out)) ** 0.5
    return jax.random.uniform(key, (fan_in, fan_out), jnp.float32,
                              minval=-bound, maxval=bound)


def init_qnet_params(key):
    relu_gain = 2.0 ** 0.5   # torch.nn.init.calculate_gain('relu')
    k1, k2, k3, k4 = jax.random.split(key, 4)
    return (
        _xavier_uniform(k1, STATE_SIZE + ACTION_SIZE, HIDDEN_SIZE, relu_gain),
        jnp.zeros((1, HIDDEN_SIZE), jnp.float32),
        _xavier_uniform(k2, HIDDEN_SIZE, HIDDEN_SIZE, relu_gain),
        jnp.zeros((1, HIDDEN_SIZE), jnp.float32),
        _xavier_uniform(k3, HIDDEN_SIZE, HIDDEN_SIZE, relu_gain),
        jnp.zeros((1, HIDDEN_SIZE), jnp.float32),
        _xavier_uniform(k4, HIDDEN_SIZE, 1, 1.0),
        jnp.zeros((1, 1), jnp.float32),
    )


def init_critic_params(key):
    k1, k2 = jax.random.split(key)
    return init_qnet_params(k1) + init_qnet_params(k2)


def pack_params(params, weight_dtype=jnp.bfloat16):
    """Pack the 16 per-layer arrays into 5 kernel operands (done once)."""
    (w1_1, b1_1, w2_1, b2_1, w3_1, b3_1, w4_1, b4_1,
     w1_2, b1_2, w2_2, b2_2, w3_2, b3_2, w4_2, b4_2) = params

    # fused layer-1 weight for both nets, split into state / action row slabs
    w1 = jnp.concatenate([w1_1, w1_2], axis=1)                 # (361, 512)
    w1s = w1[:STATE_SIZE].astype(weight_dtype)                 # (339, 512)
    w1a = w1[STATE_SIZE:].astype(weight_dtype)                 # (22, 512)

    # stacked layer-2/3 weights for both nets
    w23 = jnp.stack([w2_1, w2_2, w3_1, w3_2]).astype(weight_dtype)  # (4,256,256)

    # block-diagonal final layer: column 0 <- Q-net 1, column 1 <- Q-net 2
    w4 = jnp.zeros((H2, 2), jnp.float32)
    w4 = w4.at[:HIDDEN_SIZE, 0].set(w4_1[:, 0])
    w4 = w4.at[HIDDEN_SIZE:, 1].set(w4_2[:, 0])
    w4 = w4.astype(weight_dtype)                               # (512, 2)

    # bias slab: rows 0..2 = fused b1/b2/b3, row 3 = [b4_1, b4_2, 0...]
    b4row = (jnp.zeros((1, H2), jnp.float32)
             .at[0, 0].set(b4_1[0, 0])
             .at[0, 1].set(b4_2[0, 0]))
    bias = jnp.concatenate([
        jnp.concatenate([b1_1, b1_2], axis=1),
        jnp.concatenate([b2_1, b2_2], axis=1),
        jnp.concatenate([b3_1, b3_2], axis=1),
        b4row,
    ], axis=0).astype(jnp.float32)                             # (4, 512)

    return w1s, w1a, w23, w4, bias


# --------------------------------- forward -----------------------------------

def _row_tile(batch):
    # Small batch: one grid step (rounded up to a sublane multiple).
    # batch >= 256: at least 2 grid steps (v7x megacore), tile capped at 512.
    if batch < 256:
        return max(8, ((batch + 7) // 8) * 8)
    half = -(-batch // 2)
    return min(512, ((half + 7) // 8) * 8)


@jax.jit
def critic_forward(state, action, packed):
    w1s, w1a, w23, w4, bias = packed
    B = state.shape[0]
    tb = _row_tile(B)

    out = pl.pallas_call(
        _critic_kernel,
        out_shape=jax.ShapeDtypeStruct((B, 2), jnp.float32),
        grid=(pl.cdiv(B, tb),),
        in_specs=[
            pl.BlockSpec((tb, STATE_SIZE), lambda i: (i, 0)),     # state tile
            pl.BlockSpec((tb, ACTION_SIZE), lambda i: (i, 0)),    # action tile
            pl.BlockSpec((STATE_SIZE, H2), lambda i: (0, 0)),     # W1 (state rows)
            pl.BlockSpec((ACTION_SIZE, H2), lambda i: (0, 0)),    # W1 (action rows)
            pl.BlockSpec((4, HIDDEN_SIZE, HIDDEN_SIZE),
                         lambda i: (0, 0, 0)),                    # W2/W3 slab
            pl.BlockSpec((H2, 2), lambda i: (0, 0)),              # block-diag W4
            pl.BlockSpec((4, H2), lambda i: (0, 0)),              # bias slab
        ],
        out_specs=pl.BlockSpec((tb, 2), lambda i: (i, 0)),
        compiler_params=pltpu.CompilerParams(
            dimension_semantics=("parallel",),
            vmem_limit_bytes=32 * 1024 * 1024),
    )(state.astype(jnp.float32), action.astype(jnp.float32),
      w1s, w1a, w23, w4, bias)

    # torch: action.clone() is a functional no-op; q1/q2 returned as (B,1).
    return out[:, 0:1], out[:, 1:2]


# ------------------------------ pure-JAX reference ----------------------------

def reference_forward(state, action, params):
    # Mirrors the kernel numerics: bf16 matmul operands (including w4),
    # f32 accumulation, f32 bias/ReLU.
    x = jnp.concatenate([state, action], axis=1).astype(jnp.bfloat16)

    def q_net(p):
        w1, b1, w2, b2, w3, b3, w4, b4 = p
        h = jnp.dot(x, w1.astype(jnp.bfloat16),
                    preferred_element_type=jnp.float32) + b1
        h = jnp.maximum(h, 0.0)
        h = jnp.dot(h.astype(jnp.bfloat16), w2.astype(jnp.bfloat16),
                    preferred_element_type=jnp.float32) + b2
        h = jnp.maximum(h, 0.0)
        h = jnp.dot(h.astype(jnp.bfloat16), w3.astype(jnp.bfloat16),
                    preferred_element_type=jnp.float32) + b3
        h = jnp.maximum(h, 0.0)
        return jnp.dot(h.astype(jnp.bfloat16), w4.astype(jnp.bfloat16),
                       preferred_element_type=jnp.float32) + b4

    return q_net(params[:8]), q_net(params[8:])


if __name__ == "__main__":
    key = jax.random.PRNGKey(0)
    k_params, k_state, k_action = jax.random.split(key, 3)

    params = init_critic_params(k_params)
    packed = pack_params(params)

    B = 8
    state = jax.random.normal(k_state, (B, STATE_SIZE), jnp.float32)
    action = jax.random.normal(k_action, (B, ACTION_SIZE), jnp.float32)

    q1, q2 = critic_forward(state, action, packed)
    q1 = jax.block_until_ready(q1)
    q2 = jax.block_until_ready(q2)

    r1, r2 = reference_forward(state, action, params)
    assert q1.shape == (B, 1) and q2.shape == (B, 1)
    assert jnp.allclose(q1, r1, atol=2e-3, rtol=2e-3), float(jnp.max(jnp.abs(q1 - r1)))
    assert jnp.allclose(q2, r2, atol=2e-3, rtol=2e-3), float(jnp.max(jnp.abs(q2 - r2)))

    print("KERNEL_OK")
</pallas_src>

<mosaic_0001>
module attributes {stable_mosaic.version = 11 : i64} {
  func.func @_critic_kernel(%arg0: i32, %arg1: memref<8x339xf32, #tpu.memory_space<vmem>>, %arg2: memref<8x22xf32, #tpu.memory_space<vmem>>, %arg3: memref<339x512xbf16, #tpu.memory_space<vmem>>, %arg4: memref<22x512xbf16, #tpu.memory_space<vmem>>, %arg5: memref<4x256x256xbf16, #tpu.memory_space<vmem>>, %arg6: memref<512x2xbf16, #tpu.memory_space<vmem>>, %arg7: memref<4x512xf32, #tpu.memory_space<vmem>>, %arg8: memref<8x2xf32, #tpu.memory_space<vmem>>) attributes {dimension_semantics = [#tpu.dimension_semantics<parallel>], iteration_bounds = array<i64: 1>, scalar_prefetch = 0 : i64, scratch_operands = 0 : i64, tpu.core_type = #tpu.core_type<tc>, window_params = [{transform_indices = @transform_0, window_bounds = array<i64: 8, 339>}, {transform_indices = @transform_1, window_bounds = array<i64: 8, 22>}, {pipeline_mode = #tpu.pipeline_mode<synchronous>, transform_indices = @transform_2, window_bounds = array<i64: 339, 512>}, {pipeline_mode = #tpu.pipeline_mode<synchronous>, transform_indices = @transform_3, window_bounds = array<i64: 22, 512>}, {pipeline_mode = #tpu.pipeline_mode<synchronous>, transform_indices = @transform_4, window_bounds = array<i64: 4, 256, 256>}, {pipeline_mode = #tpu.pipeline_mode<synchronous>, transform_indices = @transform_5, window_bounds = array<i64: 512, 2>}, {pipeline_mode = #tpu.pipeline_mode<synchronous>, transform_indices = @transform_6, window_bounds = array<i64: 4, 512>}, {transform_indices = @transform_7, window_bounds = array<i64: 8, 2>}]} {
    %c0 = arith.constant 0 : index
    %c0_0 = arith.constant 0 : index
    %0 = vector.load %arg1[%c0, %c0_0] : memref<8x339xf32, #tpu.memory_space<vmem>>, vector<8x339xf32>
    %1 = arith.truncf %0 : vector<8x339xf32> to vector<8x339xbf16>
    %c0_1 = arith.constant 0 : index
    %c0_2 = arith.constant 0 : index
    %2 = vector.load %arg2[%c0_1, %c0_2] : memref<8x22xf32, #tpu.memory_space<vmem>>, vector<8x22xf32>
    %3 = arith.truncf %2 : vector<8x22xf32> to vector<8x22xbf16>
    %c0_3 = arith.constant 0 : index
    %c0_4 = arith.constant 0 : index
    %4 = vector.load %arg3[%c0_3, %c0_4] : memref<339x512xbf16, #tpu.memory_space<vmem>>, vector<339x512xbf16>
    %cst = arith.constant dense<0.000000e+00> : vector<8x512xf32>
    %5 = tpu.matmul %1, %4, %cst {dimension_numbers = #tpu.dot_dimension_numbers<[1], [0], [0], [1], [0, 0, 1, 1], [], []>} : vector<8x339xbf16>, vector<339x512xbf16>, vector<8x512xf32> -> vector<8x512xf32>
    %c0_5 = arith.constant 0 : index
    %c0_6 = arith.constant 0 : index
    %6 = vector.load %arg4[%c0_5, %c0_6] : memref<22x512xbf16, #tpu.memory_space<vmem>>, vector<22x512xbf16>
    %cst_7 = arith.constant dense<0.000000e+00> : vector<8x512xf32>
    %7 = tpu.matmul %3, %6, %cst_7 {dimension_numbers = #tpu.dot_dimension_numbers<[1], [0], [0], [1], [0, 0, 1, 1], [], []>} : vector<8x22xbf16>, vector<22x512xbf16>, vector<8x512xf32> -> vector<8x512xf32>
    %8 = arith.addf %5, %7 : vector<8x512xf32>
    %c0_8 = arith.constant 0 : index
    %c0_9 = arith.constant 0 : index
    %9 = vector.load %arg7[%c0_8, %c0_9] : memref<4x512xf32, #tpu.memory_space<vmem>>, vector<1x512xf32>
    %10 = vector.broadcast %9 : vector<1x512xf32> to vector<8x512xf32>
    %11 = arith.addf %8, %10 : vector<8x512xf32>
    %cst_10 = arith.constant 0.000000e+00 : f32
    %12 = vector.broadcast %cst_10 : f32 to vector<8x512xf32>
    %13 = arith.maximumf %11, %12 : vector<8x512xf32>
    %14 = vector.extract_strided_slice %13 {offsets = [0, 0], sizes = [8, 256], strides = [1, 1]} : vector<8x512xf32> to vector<8x256xf32>
    %15 = arith.truncf %14 : vector<8x256xf32> to vector<8x256xbf16>
    %16 = vector.extract_strided_slice %13 {offsets = [0, 256], sizes = [8, 256], strides = [1, 1]} : vector<8x512xf32> to vector<8x256xf32>
    %17 = arith.truncf %16 : vector<8x256xf32> to vector<8x256xbf16>
    %c0_11 = arith.constant 0 : index
    %c0_12 = arith.constant 0 : index
    %c0_13 = arith.constant 0 : index
    %18 = vector.load %arg5[%c0_11, %c0_12, %c0_13] : memref<4x256x256xbf16, #tpu.memory_space<vmem>>, vector<1x256x256xbf16>
    %19 = vector.shape_cast %18 : vector<1x256x256xbf16> to vector<256x256xbf16>
    %cst_14 = arith.constant dense<0.000000e+00> : vector<8x256xf32>
    %20 = tpu.matmul %15, %19, %cst_14 {dimension_numbers = #tpu.dot_dimension_numbers<[1], [0], [0], [1], [0, 0, 1, 1], [], []>} : vector<8x256xbf16>, vector<256x256xbf16>, vector<8x256xf32> -> vector<8x256xf32>
    %c1 = arith.constant 1 : index
    %c0_15 = arith.constant 0 : index
    %21 = vector.load %arg7[%c1, %c0_15] : memref<4x512xf32, #tpu.memory_space<vmem>>, vector<1x256xf32>
    %22 = vector.broadcast %21 : vector<1x256xf32> to vector<8x256xf32>
    %23 = arith.addf %20, %22 : vector<8x256xf32>
    %cst_16 = arith.constant 0.000000e+00 : f32
    %24 = vector.broadcast %cst_16 : f32 to vector<8x256xf32>
    %25 = arith.maximumf %23, %24 : vector<8x256xf32>
    %c1_17 = arith.constant 1 : index
    %c0_18 = arith.constant 0 : index
    %c0_19 = arith.constant 0 : index
    %26 = vector.load %arg5[%c1_17, %c0_18, %c0_19] : memref<4x256x256xbf16, #tpu.memory_space<vmem>>, vector<1x256x256xbf16>
    %27 = vector.shape_cast %26 : vector<1x256x256xbf16> to vector<256x256xbf16>
    %cst_20 = arith.constant dense<0.000000e+00> : vector<8x256xf32>
    %28 = tpu.matmul %17, %27, %cst_20 {dimension_numbers = #tpu.dot_dimension_numbers<[1], [0], [0], [1], [0, 0, 1, 1], [], []>} : vector<8x256xbf16>, vector<256x256xbf16>, vector<8x256xf32> -> vector<8x256xf32>
    %c1_21 = arith.constant 1 : index
    %c256 = arith.constant 256 : index
    %29 = vector.load %arg7[%c1_21, %c256] : memref<4x512xf32, #tpu.memory_space<vmem>>, vector<1x256xf32>
    %30 = vector.broadcast %29 : vector<1x256xf32> to vector<8x256xf32>
    %31 = arith.addf %28, %30 : vector<8x256xf32>
    %cst_22 = arith.constant 0.000000e+00 : f32
    %32 = vector.broadcast %cst_22 : f32 to vector<8x256xf32>
    %33 = arith.maximumf %31, %32 : vector<8x256xf32>
    %34 = arith.truncf %25 : vector<8x256xf32> to vector<8x256xbf16>
    %c2 = arith.constant 2 : index
    %c0_23 = arith.constant 0 : index
    %c0_24 = arith.constant 0 : index
    %35 = vector.load %arg5[%c2, %c0_23, %c0_24] : memref<4x256x256xbf16, #tpu.memory_space<vmem>>, vector<1x256x256xbf16>
    %36 = vector.shape_cast %35 : vector<1x256x256xbf16> to vector<256x256xbf16>
    %cst_25 = arith.constant dense<0.000000e+00> : vector<8x256xf32>
    %37 = tpu.matmul %34, %36, %cst_25 {dimension_numbers = #tpu.dot_dimension_numbers<[1], [0], [0], [1], [0, 0, 1, 1], [], []>} : vector<8x256xbf16>, vector<256x256xbf16>, vector<8x256xf32> -> vector<8x256xf32>
    %c2_26 = arith.constant 2 : index
    %c0_27 = arith.constant 0 : index
    %38 = vector.load %arg7[%c2_26, %c0_27] : memref<4x512xf32, #tpu.memory_space<vmem>>, vector<1x256xf32>
    %39 = vector.broadcast %38 : vector<1x256xf32> to vector<8x256xf32>
    %40 = arith.addf %37, %39 : vector<8x256xf32>
    %cst_28 = arith.constant 0.000000e+00 : f32
    %41 = vector.broadcast %cst_28 : f32 to vector<8x256xf32>
    %42 = arith.maximumf %40, %41 : vector<8x256xf32>
    %43 = arith.truncf %33 : vector<8x256xf32> to vector<8x256xbf16>
    %c3 = arith.constant 3 : index
    %c0_29 = arith.constant 0 : index
    %c0_30 = arith.constant 0 : index
    %44 = vector.load %arg5[%c3, %c0_29, %c0_30] : memref<4x256x256xbf16, #tpu.memory_space<vmem>>, vector<1x256x256xbf16>
    %45 = vector.shape_cast %44 : vector<1x256x256xbf16> to vector<256x256xbf16>
    %cst_31 = arith.constant dense<0.000000e+00> : vector<8x256xf32>
    %46 = tpu.matmul %43, %45, %cst_31 {dimension_numbers = #tpu.dot_dimension_numbers<[1], [0], [0], [1], [0, 0, 1, 1], [], []>} : vector<8x256xbf16>, vector<256x256xbf16>, vector<8x256xf32> -> vector<8x256xf32>
    %c2_32 = arith.constant 2 : index
    %c256_33 = arith.constant 256 : index
    %47 = vector.load %arg7[%c2_32, %c256_33] : memref<4x512xf32, #tpu.memory_space<vmem>>, vector<1x256xf32>
    %48 = vector.broadcast %47 : vector<1x256xf32> to vector<8x256xf32>
    %49 = arith.addf %46, %48 : vector<8x256xf32>
    %cst_34 = arith.constant 0.000000e+00 : f32
    %50 = vector.broadcast %cst_34 : f32 to vector<8x256xf32>
    %51 = arith.maximumf %49, %50 : vector<8x256xf32>
    %52 = arith.truncf %42 : vector<8x256xf32> to vector<8x256xbf16>
    %53 = arith.truncf %51 : vector<8x256xf32> to vector<8x256xbf16>
    %54 = tpu.concatenate %52, %53 in 1 : vector<8x256xbf16>, vector<8x256xbf16> -> vector<8x512xbf16>
    %c0_35 = arith.constant 0 : index
    %c0_36 = arith.constant 0 : index
    %55 = vector.load %arg6[%c0_35, %c0_36] : memref<512x2xbf16, #tpu.memory_space<vmem>>, vector<512x2xbf16>
    %cst_37 = arith.constant dense<0.000000e+00> : vector<8x2xf32>
    %56 = tpu.matmul %54, %55, %cst_37 {dimension_numbers = #tpu.dot_dimension_numbers<[1], [0], [0], [1], [0, 0, 1, 1], [], []>} : vector<8x512xbf16>, vector<512x2xbf16>, vector<8x2xf32> -> vector<8x2xf32>
    %c3_38 = arith.constant 3 : index
    %c0_39 = arith.constant 0 : index
    %57 = vector.load %arg7[%c3_38, %c0_39] : memref<4x512xf32, #tpu.memory_space<vmem>>, vector<1x2xf32>
    %58 = vector.broadcast %57 : vector<1x2xf32> to vector<8x2xf32>
    %59 = arith.addf %56, %58 : vector<8x2xf32>
    %c0_40 = arith.constant 0 : index
    %c0_41 = arith.constant 0 : index
    %60 = vector.load %arg8[%c0_40, %c0_41] : memref<8x2xf32, #tpu.memory_space<vmem>>, vector<8x2xf32>
    tpu.vector_store %arg8[%c0_40, %c0_41], %59 {strides = array<i32>} : memref<8x2xf32, #tpu.memory_space<vmem>>, vector<8x2xf32>,
    return
  }
  func.func @transform_0(%arg0: i32) -> (i32, i32) {
    %c0_i32 = arith.constant 0 : i32
    %c0_i32_0 = arith.constant 0 : i32
    return %arg0, %c0_i32 : i32, i32
  }
  func.func @transform_1(%arg0: i32) -> (i32, i32) {
    %c0_i32 = arith.constant 0 : i32
    %c0_i32_0 = arith.constant 0 : i32
    return %arg0, %c0_i32 : i32, i32
  }
  func.func @transform_2(%arg0: i32) -> (i32, i32) {
    %c0_i32 = arith.constant 0 : i32
    %c0_i32_0 = arith.constant 0 : i32
    %c0_i32_1 = arith.constant 0 : i32
    return %c0_i32, %c0_i32_0 : i32, i32
  }
  func.func @transform_3(%arg0: i32) -> (i32, i32) {
    %c0_i32 = arith.constant 0 : i32
    %c0_i32_0 = arith.constant 0 : i32
    %c0_i32_1 = arith.constant 0 : i32
    return %c0_i32, %c0_i32_0 : i32, i32
  }
  func.func @transform_4(%arg0: i32) -> (i32, i32, i32) {
    %c0_i32 = arith.constant 0 : i32
    %c0_i32_0 = arith.constant 0 : i32
    %c0_i32_1 = arith.constant 0 : i32
    %c0_i32_2 = arith.constant 0 : i32
    return %c0_i32, %c0_i32_0, %c0_i32_1 : i32, i32, i32
  }
  func.func @transform_5(%arg0: i32) -> (i32, i32) {
    %c0_i32 = arith.constant 0 : i32
    %c0_i32_0 = arith.constant 0 : i32
    %c0_i32_1 = arith.constant 0 : i32
    return %c0_i32, %c0_i32_0 : i32, i32
  }
  func.func @transform_6(%arg0: i32) -> (i32, i32) {
    %c0_i32 = arith.constant 0 : i32
    %c0_i32_0 = arith.constant 0 : i32
    %c0_i32_1 = arith.constant 0 : i32
    return %c0_i32, %c0_i32_0 : i32, i32
  }
  func.func @transform_7(%arg0: i32) -> (i32, i32) {
    %c0_i32 = arith.constant 0 : i32
    %c0_i32_0 = arith.constant 0 : i32
    return %arg0, %c0_i32 : i32, i32
  }
}

</mosaic_0001>

<bundles_post_ra>
// kernel: critic_forward.1
= control target key start
LH: loop header
LB: loop body
LE: loop exit
PB: predicated region body
PF: predicated region fallthrough
CT: control target
= control target key end

     0   :  { %12 = vsyncpa [#allocation3], 0  ;;  %s3268_s0 = inlined_call_operand.vmem [shape: f32[8,339], index: 0, kind: input, shape index: {}]   ;;  %s3269_s1 = inlined_call_operand.vmem [shape: f32[8,22], index: 1, kind: input, shape index: {}]   ;;  %s3270_s2 = inlined_call_operand.hbm [shape: bf16[339,512], index: 2, kind: input, shape index: {}]   ;;  %s3271_s3 = inlined_call_operand.vmem [shape: bf16[22,512], index: 3, kind: input, shape index: {}]   ;;  %s3272_s4 = inlined_call_operand.hbm [shape: bf16[4,256,256], index: 4, kind: input, shape index: {}]   ;;  %s3273_s5 = inlined_call_operand.vmem [shape: bf16[512,2], index: 5, kind: input, shape index: {}]   ;;  %s3274_s6 = inlined_call_operand.vmem [shape: f32[4,512], index: 6, kind: input, shape index: {}]   ;;  %s3275_s7 = inlined_call_operand.vmem [shape: f32[8,2], index: 7, kind: output, shape index: {}]  }
   0x1   :  { %13 = vsyncpa [#allocation5], 0  ;;  %s3015_s24 = smov [#allocation2]   ;;  %s2967_s28 = scalar_lea.hbm %s3270_s2, 11008 }
   0x2   :  { %s23_s25 = sshll.u32 %s3015_s24, 4  ;;  %p2968_p0 = scmp.ne.s32.totalorder %s3270_s2, %s2967_s28  ;;  %s24_s25 = int_to_ptr.vmem [resolvable:$true] %s23_s25 }
   0x3   :  { %p2971_p1 = scmp.lt.u32.totalorder %s2967_s28, %s3270_s2 }
   0x5   :  { %p2973_p2 = pnand %p2971_p1, %p2968_p0 }
   0x7   :  { %2976 = shalt.err (!%p2973_p2)
}
   0x8   :  { %s2977_s10 = scalar_lea.vmem %s24_s25, 11008  ;;  %p2982_p4 = scmp.lt.s32.totalorder %s24_s25, %s24_s25 }
   0x9   :  { %p2978_p3 = scmp.ne.s32.totalorder %s24_s25, %s2977_s10  ;;  %p2983_p5 = scmp.lt.s32.totalorder %s2977_s10, %s2977_s10 }
   0xb   :  { %p2984_p6 = por %p2983_p5, %p2982_p4 }
   0xd   :  { %p2985_p7 = pnand %p2984_p6, %p2978_p3 }
   0xf   :  { %2988 = shalt.err (!%p2985_p7)
}
  0x10   :  { %s3016_s11 = smov 256   ;;  %s3017_s12 = smov 16  }
  0x11   :  { %29 = dma.hbm_to_vmem [thread:$0]  %s3270_s2, 11008, %s24_s25, [#allocation3], %s3016_s11, %s3016_s11, %s3017_s12  }
  0x12   :  { %s3018_s15 = smov [#allocation4]   ;;  %s2989_s19 = scalar_lea.hbm %s3272_s4, 16384 }
  0x13   :  { %s37_s16 = sshll.u32 %s3018_s15, 4  ;;  %p2990_p8 = scmp.ne.s32.totalorder %s3272_s4, %s2989_s19  ;;  %s38_s16 = int_to_ptr.vmem [resolvable:$true] %s37_s16 }
  0x14   :  { %p2993_p9 = scmp.lt.u32.totalorder %s2989_s19, %s3272_s4 }
  0x16   :  { %p2995_p10 = pnand %p2993_p9, %p2990_p8 }
  0x18   :  { %2998 = shalt.err (!%p2995_p10)
}
  0x19   :  { %s2999_s24 = scalar_lea.vmem %s38_s16, 16384  ;;  %p3004_p12 = scmp.lt.s32.totalorder %s38_s16, %s38_s16 }
  0x1a   :  { %p3000_p11 = scmp.ne.s32.totalorder %s38_s16, %s2999_s24  ;;  %p3005_p13 = scmp.lt.s32.totalorder %s2999_s24, %s2999_s24 }
  0x1c   :  { %p3006_p0 = por %p3005_p13, %p3004_p12 }
  0x1e   :  { %p3007_p1 = pnand %p3006_p0, %p3000_p11 }
  0x20   :  { %3010 = shalt.err (!%p3007_p1)
}
  0x21   :  { %s3019_s2 = smov 128   ;;  %s3020_s25 = smov 8  }
  0x22   :  { %43 = dma.hbm_to_vmem [thread:$0]  %s3272_s4, 16384, %s38_s16, [#allocation5], %s3019_s2, %s3019_s2, %s3020_s25  }
  0x23   :  { %3011 = dma.done.wait [#allocation3], 11008  }
  0x24   :  { %3012 = vsyncadd [#allocation3], 4294956288 }
  0x25   :  { %3013 = dma.done.wait [#allocation5], 16384  }
  0x26   :  { %3014 = vsyncadd [#allocation5], 4294950912  ;;  %v3021_v0 = vmov 0   ;;  %v2603_v1 = vld [vmem:[%s3271_s3 + $0x4] ss:$16 sps:$4 sm:$0xff]   ;;  %vm189_vm0 = vcmask 1042432  }
  0x27   :  { %234 = vmatprep.mubr.bf16.mxu0 %v3021_v0  ;;  %275 = vmatprep.mubr.bf16.mxu1 %v3021_v0  ;;  %v2605_v2 = vld [vmem:[%s3271_s3 + $0xc] ss:$16 sps:$4 sm:$0xff]   ;;  %v2607_v3 = vld [vmem:[%s3271_s3] ss:$16 sps:$4 sm:$0xff]   ;;  %v2608_v4 = vld [vmem:[%s3271_s3 + $0x8] ss:$16 sps:$4 sm:$0xff]  }
  0x28   :  { %202 = vmatprep.subr.bf16.mxu0 %v2603_v1  ;;  %v153_v5 = vld [vmem:[%s3271_s3 + $0x20] sm:$0x77]  ;;  %243 = vmatprep.subr.bf16.mxu1 %v2605_v2  ;;  %v154_v7 = vld [vmem:[%s3271_s3 + $0x28] sm:$0x77]  ;;  %vm185_vm1 = vcmask 179200   ;;  %vm718_vm2 = vcmask 1040384  }
  0x29   :  { %v2289_v6 = vcombine.high %v153_v5, %v153_v5  ;;  %v2288_v8 = vcombine.low %v153_v5, %v153_v5  ;;  %203 = vmatpush1.bf16.msra.mxu0 %v2607_v3  ;;  %244 = vmatpush1.bf16.msra.mxu1 %v2608_v4  ;;  %v2291_v9 = vcombine.high %v154_v7, %v154_v7  ;;  %v61_v11 = vld [vmem:[%s3269_s1] sm:$0xff]  ;;  %vm719_vm3 = vcmask 1041408   ;;  %v57_v45 = vld [vmem:[%s3268_s0 + $0x10] sm:$0xff]  ;;  %v2653_v47 = vld [vmem:[#allocation2 + $0xc] ss:$16 sps:$4 sm:$0xff]  }
  0x2a   :  { %v2290_v10 = vcombine.low %v154_v7, %v154_v7  ;;  %v2615_v13 = vld [vmem:[#allocation2 + $0x4] ss:$16 sps:$4 sm:$0xff]   ;;  %v62_v16 = vpack.c.bf16 %v61_v11, %v61_v11  ;;  %v2613_v17 = vld [vmem:[#allocation2] ss:$16 sps:$4 sm:$0xff]   ;;  %v3022_v31 = vmov 65535   ;;  %v3122_v49 = vpack.c.bf16 %v57_v45, %v57_v45  ;;  %v56_v2 = vld [vmem:[%s3268_s0 + $0x8] sm:$0xff] }
  0x2b   :  { %2292 = vmatprep.subr.msk.bf16.mxu0 %vm189_vm0, %v2289_v6  ;;  %v191_v12 = vsel %vm189_vm0, %v2288_v8, 0  ;;  %2294 = vmatprep.subr.msk.bf16.mxu1 %vm189_vm0, %v2291_v9  ;;  %v2618_v15 = vld [vmem:[#allocation2 + $0x204] ss:$16 sps:$4 sm:$0xff]   ;;  %v2616_v18 = vld [vmem:[#allocation2 + $0x200] ss:$16 sps:$4 sm:$0xff]   ;;  %v720_v32 = vsel %vm718_vm2, 4294967295, %v3022_v31  ;;  %v59_v3 = vpack.c.bf16 %v56_v2, %v56_v2 }
  0x2c   :  { %v197_v14 = vsel %vm189_vm0, %v2290_v10, 0  ;;  %v2621_v19 = vld [vmem:[#allocation2 + $0x24] ss:$16 sps:$4 sm:$0xff]   ;;  %v2619_v21 = vld [vmem:[#allocation2 + $0x20] ss:$16 sps:$4 sm:$0xff]   ;;  %v3115_v37 = vsel %vm719_vm3, %v720_v32, 0 }
  0x2d   :  { %205 = vmatpush1.bf16.msra.mxu0 %v191_v12  ;;  %246 = vmatpush1.bf16.msra.mxu1 %v197_v14  ;;  %v2624_v20 = vld [vmem:[#allocation2 + $0x224] ss:$16 sps:$4 sm:$0xff]   ;;  %v2622_v22 = vld [vmem:[#allocation2 + $0x220] ss:$16 sps:$4 sm:$0xff]   ;;  %vm714_vm4 = vcmask 678912   ;;  %vm2276_vm5 = vcmask 15360  }
  0x2e   :  { %734 = vmatprep.subr.bf16.mxu0 %v2615_v13  ;;  %775 = vmatprep.subr.bf16.mxu1 %v2618_v15  ;;  %v2627_v23 = vld [vmem:[#allocation2 + $0x44] ss:$16 sps:$4 sm:$0xff]   ;;  %v2625_v25 = vld [vmem:[#allocation2 + $0x40] ss:$16 sps:$4 sm:$0xff]   ;;  %v2651_v50 = vld [vmem:[#allocation2 + $0x8] ss:$16 sps:$4 sm:$0xff]  }
  0x2f   :  { %v2630_v24 = vld [vmem:[#allocation2 + $0x244] ss:$16 sps:$4 sm:$0xff]   ;;  %v2628_v26 = vld [vmem:[#allocation2 + $0x240] ss:$16 sps:$4 sm:$0xff]   ;;  %v2659_v52 = vld [vmem:[#allocation2 + $0x2c] ss:$16 sps:$4 sm:$0xff]  }
  0x30   :  { %2293 = vmatmul.mubr.msk.bf16.vlgmr.msra.gmra.mrb[0].mxu0 %vm185_vm1, %v62_v16  ;;  %2295 = vmatmul.mubr.msk.bf16.vlgmr.msra.gmra.mrb[0].mxu1 %vm185_vm1, %v62_v16  ;;  %v2633_v27 = vld [vmem:[#allocation2 + $0x64] ss:$16 sps:$4 sm:$0xff]   ;;  %v2631_v30 = vld [vmem:[#allocation2 + $0x60] ss:$16 sps:$4 sm:$0xff]   ;;  %v2657_v54 = vld [vmem:[#allocation2 + $0x28] ss:$16 sps:$4 sm:$0xff]  }
  0x31   :  { %735 = vmatpush1.bf16.msra.mxu0 %v2613_v17  ;;  %776 = vmatpush1.bf16.msra.mxu1 %v2616_v18  ;;  %v2636_v28 = vld [vmem:[#allocation2 + $0x264] ss:$16 sps:$4 sm:$0xff]   ;;  %v2634_v33 = vld [vmem:[#allocation2 + $0x260] ss:$16 sps:$4 sm:$0xff]   ;;  %v2665_v56 = vld [vmem:[#allocation2 + $0x4c] ss:$16 sps:$4 sm:$0xff]  }
  0x32   :  { %736 = vmatprep.subr.bf16.mxu0 %v2621_v19  ;;  %777 = vmatprep.subr.bf16.mxu1 %v2624_v20  ;;  %v147_v29 = vld [vmem:[#allocation2 + $0x2a0] sm:$0x33]  ;;  %v2663_v58 = vld [vmem:[#allocation2 + $0x48] ss:$16 sps:$4 sm:$0xff]   ;;  %v2671_v60 = vld [vmem:[#allocation2 + $0x6c] ss:$16 sps:$4 sm:$0xff]  }
  0x33   :  { %807 = vmatprep.mubr.bf16.mxu1 %v3021_v0  ;;  %v2639_v34 = vld [vmem:[#allocation2 + $0x84] ss:$16 sps:$4 sm:$0xff]   ;;  %v2381_v36 = vcombine.high %v147_v29, %v147_v29  ;;  %v2637_v38 = vld [vmem:[#allocation2 + $0x80] ss:$16 sps:$4 sm:$0xff]   ;;  %v2380_v40 = vcombine.low %v147_v29, %v147_v29  ;;  %v2669_v62 = vld [vmem:[#allocation2 + $0x68] ss:$16 sps:$4 sm:$0xff]   ;;  %766 = vmatprep.mubr.bf16.mxu0 %v59_v3 }
  0x34   :  { %v2642_v35 = vld [vmem:[#allocation2 + $0x284] ss:$16 sps:$4 sm:$0xff]   ;;  %v2640_v39 = vld [vmem:[#allocation2 + $0x280] ss:$16 sps:$4 sm:$0xff]   ;;  %v2677_v1 = vld [vmem:[#allocation2 + $0x8c] ss:$16 sps:$4 sm:$0xff]  }
  0x35   :  { %737 = vmatpush1.bf16.msra.mxu0 %v2619_v21  ;;  %778 = vmatpush1.bf16.msra.mxu1 %v2622_v22  ;;  %v2645_v41 = vld [vmem:[#allocation2 + $0xa4] ss:$16 sps:$4 sm:$0xff]   ;;  %v726_v42 = vand.u32 %v2381_v36, %v3115_v37  ;;  %v2643_v43 = vld [vmem:[#allocation2 + $0xa0] ss:$16 sps:$4 sm:$0xff]   ;;  %v723_v44 = vand.u32 %v2380_v40, %v3115_v37  ;;  %v2675_v5 = vld [vmem:[#allocation2 + $0x88] ss:$16 sps:$4 sm:$0xff]  }
  0x36   :  { %738 = vmatprep.subr.bf16.mxu0 %v2627_v23  ;;  %779 = vmatprep.subr.bf16.mxu1 %v2630_v24  ;;  %v2650_v46 = vld [vmem:[#allocation2 + $0xc4] ss:$16 sps:$4 sm:$0xff]   ;;  %v2648_v48 = vld [vmem:[#allocation2 + $0xc0] ss:$16 sps:$4 sm:$0xff]   ;;  %v2683_v7 = vld [vmem:[#allocation2 + $0xac] ss:$16 sps:$4 sm:$0xff]  }
  0x37   :  { %v2656_v51 = vld [vmem:[#allocation2 + $0xe4] ss:$16 sps:$4 sm:$0xff]   ;;  %v2654_v53 = vld [vmem:[#allocation2 + $0xe0] ss:$16 sps:$4 sm:$0xff]   ;;  %v2681_v9 = vld [vmem:[#allocation2 + $0xa8] ss:$16 sps:$4 sm:$0xff]  }
  0x38   :  { %v2662_v55 = vld [vmem:[#allocation2 + $0x104] ss:$16 sps:$4 sm:$0xff]   ;;  %v2660_v57 = vld [vmem:[#allocation2 + $0x100] ss:$16 sps:$4 sm:$0xff]   ;;  %v2689_v11 = vld [vmem:[#allocation2 + $0xcc] ss:$16 sps:$4 sm:$0xff]  }
  0x39   :  { %739 = vmatpush1.bf16.msra.mxu0 %v2625_v25  ;;  %780 = vmatpush1.bf16.msra.mxu1 %v2628_v26  ;;  %v2668_v59 = vld [vmem:[#allocation2 + $0x124] ss:$16 sps:$4 sm:$0xff]   ;;  %v2666_v61 = vld [vmem:[#allocation2 + $0x120] ss:$16 sps:$4 sm:$0xff]   ;;  %v2687_v13 = vld [vmem:[#allocation2 + $0xc8] ss:$16 sps:$4 sm:$0xff]  }
  0x3a   :  { %740 = vmatprep.subr.bf16.mxu0 %v2633_v27  ;;  %781 = vmatprep.subr.bf16.mxu1 %v2636_v28  ;;  %v2674_v63 = vld [vmem:[#allocation2 + $0x144] ss:$16 sps:$4 sm:$0xff]   ;;  %v2672_v4 = vld [vmem:[#allocation2 + $0x140] ss:$16 sps:$4 sm:$0xff]   ;;  %v2695_v15 = vld [vmem:[#allocation2 + $0xec] ss:$16 sps:$4 sm:$0xff]  }
  0x3b   :  { %v2680_v6 = vld [vmem:[#allocation2 + $0x164] ss:$16 sps:$4 sm:$0xff]   ;;  %v2678_v8 = vld [vmem:[#allocation2 + $0x160] ss:$16 sps:$4 sm:$0xff]   ;;  %v2693_v17 = vld [vmem:[#allocation2 + $0xe8] ss:$16 sps:$4 sm:$0xff]  }
  0x3c   :  { %v2686_v10 = vld [vmem:[#allocation2 + $0x184] ss:$16 sps:$4 sm:$0xff]   ;;  %v2684_v12 = vld [vmem:[#allocation2 + $0x180] ss:$16 sps:$4 sm:$0xff]   ;;  %v2701_v19 = vld [vmem:[#allocation2 + $0x10c] ss:$16 sps:$4 sm:$0xff]  }
  0x3d   :  { %741 = vmatpush1.bf16.msra.mxu0 %v2631_v30  ;;  %782 = vmatpush1.bf16.msra.mxu1 %v2634_v33  ;;  %v2692_v14 = vld [vmem:[#allocation2 + $0x1a4] ss:$16 sps:$4 sm:$0xff]   ;;  %v2690_v16 = vld [vmem:[#allocation2 + $0x1a0] ss:$16 sps:$4 sm:$0xff]   ;;  %v2699_v21 = vld [vmem:[#allocation2 + $0x108] ss:$16 sps:$4 sm:$0xff]  }
  0x3e   :  { %742 = vmatprep.subr.bf16.mxu0 %v2639_v34  ;;  %783 = vmatprep.subr.bf16.mxu1 %v2642_v35  ;;  %v2698_v18 = vld [vmem:[#allocation2 + $0x1c4] ss:$16 sps:$4 sm:$0xff]   ;;  %v2696_v20 = vld [vmem:[#allocation2 + $0x1c0] ss:$16 sps:$4 sm:$0xff]   ;;  %v2707_v23 = vld [vmem:[#allocation2 + $0x12c] ss:$16 sps:$4 sm:$0xff]  }
  0x3f   :  { %v2704_v22 = vld [vmem:[#allocation2 + $0x1e4] ss:$16 sps:$4 sm:$0xff]   ;;  %v2702_v24 = vld [vmem:[#allocation2 + $0x1e0] ss:$16 sps:$4 sm:$0xff]   ;;  %v2705_v25 = vld [vmem:[#allocation2 + $0x128] ss:$16 sps:$4 sm:$0xff]  }
  0x40   :  { %v55_v26 = vld [vmem:[%s3268_s0] sm:$0xff]  ;;  %v2710_v27 = vld [vmem:[#allocation2 + $0x14c] ss:$16 sps:$4 sm:$0xff]   ;;  %v2708_v29 = vld [vmem:[#allocation2 + $0x148] ss:$16 sps:$4 sm:$0xff]  }
  0x41   :  { %743 = vmatpush1.bf16.msra.mxu0 %v2637_v38  ;;  %784 = vmatpush1.bf16.msra.mxu1 %v2640_v39  ;;  %v2713_v28 = vld [vmem:[#allocation2 + $0x20c] ss:$16 sps:$4 sm:$0xff]   ;;  %v2711_v30 = vld [vmem:[#allocation2 + $0x208] ss:$16 sps:$4 sm:$0xff]   ;;  %v58_v31 = vpack.c.bf16 %v55_v26, %v55_v26 }
  0x42   :  { %744 = vmatprep.subr.bf16.mxu0 %v2645_v41  ;;  %785 = vmatprep.subr.bf16.mxu1 %v726_v42  ;;  %v2716_v32 = vld [vmem:[#allocation2 + $0x16c] ss:$16 sps:$4 sm:$0xff]   ;;  %v2714_v34 = vld [vmem:[#allocation2 + $0x168] ss:$16 sps:$4 sm:$0xff]  }
  0x43   :  { %v2719_v33 = vld [vmem:[#allocation2 + $0x22c] ss:$16 sps:$4 sm:$0xff]   ;;  %v2717_v35 = vld [vmem:[#allocation2 + $0x228] ss:$16 sps:$4 sm:$0xff]  }
  0x44   :  { %v2722_v36 = vld [vmem:[#allocation2 + $0x18c] ss:$16 sps:$4 sm:$0xff]   ;;  %v2720_v39 = vld [vmem:[#allocation2 + $0x188] ss:$16 sps:$4 sm:$0xff]  }
  0x45   :  { %745 = vmatpush1.bf16.msra.mxu0 %v2643_v43  ;;  %786 = vmatpush1.bf16.msra.mxu1 %v723_v44  ;;  %v2725_v38 = vld [vmem:[#allocation2 + $0x24c] ss:$16 sps:$4 sm:$0xff]   ;;  %v2723_v40 = vld [vmem:[#allocation2 + $0x248] ss:$16 sps:$4 sm:$0xff]  }
  0x46   :  { %746 = vmatprep.subr.bf16.mxu0 %v2650_v46  ;;  %816 = vmatprep.subr.bf16.mxu1 %v2653_v47  ;;  %v2728_v41 = vld [vmem:[#allocation2 + $0x1ac] ss:$16 sps:$4 sm:$0xff]   ;;  %v2726_v44 = vld [vmem:[#allocation2 + $0x1a8] ss:$16 sps:$4 sm:$0xff]  }
  0x47   :  { %v2731_v42 = vld [vmem:[#allocation2 + $0x26c] ss:$16 sps:$4 sm:$0xff]   ;;  %v2729_v45 = vld [vmem:[#allocation2 + $0x268] ss:$16 sps:$4 sm:$0xff]  }
  0x48   :  { %2384 = vmatmul.mubr.msk.bf16.vlgmr.msra.gmra.mrb[4].mxu1 %vm714_vm4, %v3122_v49  ;;  %v148_v43 = vld [vmem:[#allocation2 + $0x2a8] sm:$0x33] }
  0x49   :  { %747 = vmatpush1.bf16.msra.mxu0 %v2648_v48  ;;  %817 = vmatpush1.bf16.msra.mxu1 %v2651_v50  ;;  %v2734_v46 = vld [vmem:[#allocation2 + $0x1cc] ss:$16 sps:$4 sm:$0xff]   ;;  %v2383_v48 = vcombine.high %v148_v43, %v148_v43  ;;  %v2732_v50 = vld [vmem:[#allocation2 + $0x1c8] ss:$16 sps:$4 sm:$0xff]  }
  0x4a   :  { %748 = vmatprep.subr.bf16.mxu0 %v2656_v51  ;;  %818 = vmatprep.subr.bf16.mxu1 %v2659_v52  ;;  %v2737_v47 = vld [vmem:[#allocation2 + $0x28c] ss:$16 sps:$4 sm:$0xff]   ;;  %v2735_v51 = vld [vmem:[#allocation2 + $0x288] ss:$16 sps:$4 sm:$0xff]  }
  0x4b   :  { %848 = vmatprep.mubr.bf16.mxu1 %v59_v3  ;;  %v2740_v52 = vld [vmem:[#allocation2 + $0x1ec] ss:$16 sps:$4 sm:$0xff]   ;;  %v2764_v3 = vld [vmem:[#allocation4 + $0x100] ss:$8 sps:$4 sm:$0xff]  }
  0x4c   :  { %v2760_v2 = vld [vmem:[#allocation4 + $0x54] ss:$8 sps:$4 sm:$0xff]  }
  0x4d   :  { %749 = vmatpush1.bf16.msra.mxu0 %v2654_v53  ;;  %819 = vmatpush1.bf16.msra.mxu1 %v2657_v54  ;;  %v732_v53 = vand.u32 %v2383_v48, %v3115_v37  ;;  %v2738_v54 = vld [vmem:[#allocation2 + $0x1e8] ss:$16 sps:$4 sm:$0xff]   ;;  %v2793_v26 = vld [vmem:[#allocation4 + $0xb4] ss:$8 sps:$4 sm:$0xff]   ;;  %v2829_v48 = vld [vmem:[#allocation4 + $0x1c4] ss:$8 sps:$4 sm:$0xff]  }
  0x4e   :  { %750 = vmatprep.subr.bf16.mxu0 %v2662_v55  ;;  %820 = vmatprep.subr.bf16.mxu1 %v2665_v56  ;;  %v2743_v56 = vld [vmem:[#allocation4] ss:$8 sps:$4 sm:$0xff]  }
  0x51   :  { %751 = vmatpush1.bf16.msra.mxu0 %v2660_v57  ;;  %821 = vmatpush1.bf16.msra.mxu1 %v2663_v58  ;;  %v2745_v57 = vld [vmem:[#allocation4 + $0x4] ss:$8 sps:$4 sm:$0xff]   ;;  %v2748_v58 = vld [vmem:[#allocation4 + $0x14] ss:$8 sps:$4 sm:$0xff]  }
  0x52   :  { %752 = vmatprep.subr.bf16.mxu0 %v2668_v59  ;;  %822 = vmatprep.subr.bf16.mxu1 %v2671_v60  ;;  %v2746_v59 = vld [vmem:[#allocation4 + $0x10] ss:$8 sps:$4 sm:$0xff]   ;;  %v2751_v60 = vld [vmem:[#allocation4 + $0x24] ss:$8 sps:$4 sm:$0xff]  }
  0x55   :  { %753 = vmatpush1.bf16.msra.mxu0 %v2666_v61  ;;  %823 = vmatpush1.bf16.msra.mxu1 %v2669_v62  ;;  %v2749_v61 = vld [vmem:[#allocation4 + $0x20] ss:$8 sps:$4 sm:$0xff]   ;;  %v2752_v62 = vld [vmem:[#allocation4 + $0x30] ss:$8 sps:$4 sm:$0xff]  }
  0x56   :  { %754 = vmatprep.subr.bf16.mxu0 %v2674_v63  ;;  %824 = vmatprep.subr.bf16.mxu1 %v2677_v1  ;;  %v2755_v63 = vld [vmem:[#allocation4 + $0x40] ss:$8 sps:$4 sm:$0xff]   ;;  %v2757_v1 = vld [vmem:[#allocation4 + $0x44] ss:$8 sps:$4 sm:$0xff]  }
  0x59   :  { %755 = vmatpush1.bf16.msra.mxu0 %v2672_v4  ;;  %825 = vmatpush1.bf16.msra.mxu1 %v2675_v5  ;;  %v2766_v4 = vld [vmem:[#allocation4 + $0x104] ss:$8 sps:$4 sm:$0xff]   ;;  %v2772_v5 = vld [vmem:[#allocation4 + $0x114] ss:$8 sps:$4 sm:$0xff]  }
  0x5a   :  { %756 = vmatprep.subr.bf16.mxu0 %v2680_v6  ;;  %826 = vmatprep.subr.bf16.mxu1 %v2683_v7  ;;  %v2763_v6 = vld [vmem:[#allocation4 + $0x64] ss:$8 sps:$4 sm:$0xff]   ;;  %v2770_v7 = vld [vmem:[#allocation4 + $0x110] ss:$8 sps:$4 sm:$0xff]  }
  0x5d   :  { %757 = vmatpush1.bf16.msra.mxu0 %v2678_v8  ;;  %827 = vmatpush1.bf16.msra.mxu1 %v2681_v9  ;;  %v2778_v8 = vld [vmem:[#allocation4 + $0x124] ss:$8 sps:$4 sm:$0xff]   ;;  %v2761_v9 = vld [vmem:[#allocation4 + $0x60] ss:$8 sps:$4 sm:$0xff]  }
  0x5e   :  { %758 = vmatprep.subr.bf16.mxu0 %v2686_v10  ;;  %828 = vmatprep.subr.bf16.mxu1 %v2689_v11  ;;  %v2769_v10 = vld [vmem:[#allocation4 + $0x74] ss:$8 sps:$4 sm:$0xff]   ;;  %v2767_v11 = vld [vmem:[#allocation4 + $0x70] ss:$8 sps:$4 sm:$0xff]  }
  0x61   :  { %759 = vmatpush1.bf16.msra.mxu0 %v2684_v12  ;;  %829 = vmatpush1.bf16.msra.mxu1 %v2687_v13  ;;  %v2776_v12 = vld [vmem:[#allocation4 + $0x120] ss:$8 sps:$4 sm:$0xff]   ;;  %v2775_v13 = vld [vmem:[#allocation4 + $0x84] ss:$8 sps:$4 sm:$0xff]  }
  0x62   :  { %760 = vmatprep.subr.bf16.mxu0 %v2692_v14  ;;  %830 = vmatprep.subr.bf16.mxu1 %v2695_v15  ;;  %v2784_v14 = vld [vmem:[#allocation4 + $0x134] ss:$8 sps:$4 sm:$0xff]   ;;  %v2782_v15 = vld [vmem:[#allocation4 + $0x130] ss:$8 sps:$4 sm:$0xff]  }
  0x65   :  { %761 = vmatpush1.bf16.msra.mxu0 %v2690_v16  ;;  %831 = vmatpush1.bf16.msra.mxu1 %v2693_v17  ;;  %v2790_v16 = vld [vmem:[#allocation4 + $0x144] ss:$8 sps:$4 sm:$0xff]   ;;  %v2773_v17 = vld [vmem:[#allocation4 + $0x80] ss:$8 sps:$4 sm:$0xff]  }
  0x66   :  { %762 = vmatprep.subr.bf16.mxu0 %v2698_v18  ;;  %832 = vmatprep.subr.bf16.mxu1 %v2701_v19  ;;  %v2781_v18 = vld [vmem:[#allocation4 + $0x94] ss:$8 sps:$4 sm:$0xff]   ;;  %v2788_v19 = vld [vmem:[#allocation4 + $0x140] ss:$8 sps:$4 sm:$0xff]  }
  0x69   :  { %763 = vmatpush1.bf16.msra.mxu0 %v2696_v20  ;;  %833 = vmatpush1.bf16.msra.mxu1 %v2699_v21  ;;  %v2796_v20 = vld [vmem:[#allocation4 + $0x154] ss:$8 sps:$4 sm:$0xff]   ;;  %v2779_v21 = vld [vmem:[#allocation4 + $0x90] ss:$8 sps:$4 sm:$0xff]  }
  0x6a   :  { %764 = vmatprep.subr.bf16.mxu0 %v2704_v22  ;;  %834 = vmatprep.subr.bf16.mxu1 %v2707_v23  ;;  %v2787_v22 = vld [vmem:[#allocation4 + $0xa4] ss:$8 sps:$4 sm:$0xff]   ;;  %v2794_v23 = vld [vmem:[#allocation4 + $0x150] ss:$8 sps:$4 sm:$0xff]  }
  0x6d   :  { %765 = vmatpush1.bf16.msra.mxu0 %v2702_v24  ;;  %835 = vmatpush1.bf16.msra.mxu1 %v2705_v25  ;;  %v2802_v24 = vld [vmem:[#allocation4 + $0x164] ss:$8 sps:$4 sm:$0xff]   ;;  %v2785_v25 = vld [vmem:[#allocation4 + $0xa0] ss:$8 sps:$4 sm:$0xff]  }
  0x6e   :  { %836 = vmatprep.subr.bf16.mxu1 %v2710_v27  ;;  %857 = vmatprep.subr.bf16.mxu0 %v2713_v28  ;;  %v2800_v27 = vld [vmem:[#allocation4 + $0x160] ss:$8 sps:$4 sm:$0xff]   ;;  %v2791_v28 = vld [vmem:[#allocation4 + $0xb0] ss:$8 sps:$4 sm:$0xff]  }
  0x70   :  { %767 = vmatmul.mubr.bf16.vlgmr.msra.gmra.mrb[4].mxu0 %v58_v31 }
  0x71   :  { %837 = vmatpush1.bf16.msra.mxu1 %v2708_v29  ;;  %858 = vmatpush1.bf16.msra.mxu0 %v2711_v30  ;;  %v2799_v29 = vld [vmem:[#allocation4 + $0xc4] ss:$8 sps:$4 sm:$0xff]   ;;  %v2797_v30 = vld [vmem:[#allocation4 + $0xc0] ss:$8 sps:$4 sm:$0xff]  }
  0x72   :  { %838 = vmatprep.subr.bf16.mxu1 %v2716_v32  ;;  %859 = vmatprep.subr.bf16.mxu0 %v2719_v33  ;;  %v2808_v32 = vld [vmem:[#allocation4 + $0x174] ss:$8 sps:$4 sm:$0xff]   ;;  %v2803_v33 = vld [vmem:[#allocation4 + $0xd0] ss:$8 sps:$4 sm:$0xff]  }
  0x73   :  { %889 = vmatprep.mubr.bf16.mxu0 %v3021_v0  ;;  %v2382_v0 = vcombine.low %v148_v43, %v148_v43  ;;  %v2818_v43 = vld [vmem:[#allocation4 + $0x190] ss:$8 sps:$4 sm:$0xff]  }
  0x75   :  { %839 = vmatpush1.bf16.msra.mxu1 %v2714_v34  ;;  %860 = vmatpush1.bf16.msra.mxu0 %v2717_v35  ;;  %v729_v55 = vand.u32 %v2382_v0, %v3115_v37  ;;  %v2754_v37 = vld [vmem:[#allocation4 + $0x34] ss:$8 sps:$4 sm:$0xff]   ;;  %v2806_v34 = vld [vmem:[#allocation4 + $0x170] ss:$8 sps:$4 sm:$0xff]   ;;  %v2811_v35 = vld [vmem:[#allocation4 + $0xe4] ss:$8 sps:$4 sm:$0xff]  }
  0x76   :  { %840 = vmatprep.subr.bf16.mxu1 %v2722_v36  ;;  %861 = vmatprep.subr.bf16.mxu0 %v2725_v38  ;;  %v2814_v36 = vld [vmem:[#allocation4 + $0x184] ss:$8 sps:$4 sm:$0xff]   ;;  %v2809_v38 = vld [vmem:[#allocation4 + $0xe0] ss:$8 sps:$4 sm:$0xff]  }
  0x77   :  { %v2835_v0 = vld [vmem:[#allocation4 + $0x1e4] ss:$8 sps:$4 sm:$0xff]  }
  0x79   :  { %841 = vmatpush1.bf16.msra.mxu1 %v2720_v39  ;;  %862 = vmatpush1.bf16.msra.mxu0 %v2723_v40  ;;  %v2812_v39 = vld [vmem:[#allocation4 + $0x180] ss:$8 sps:$4 sm:$0xff]   ;;  %v2817_v40 = vld [vmem:[#allocation4 + $0xf4] ss:$8 sps:$4 sm:$0xff]  }
  0x7a   :  { %842 = vmatprep.subr.bf16.mxu1 %v2728_v41  ;;  %863 = vmatprep.subr.bf16.mxu0 %v2731_v42  ;;  %v2820_v41 = vld [vmem:[#allocation4 + $0x194] ss:$8 sps:$4 sm:$0xff]   ;;  %v2815_v42 = vld [vmem:[#allocation4 + $0xf0] ss:$8 sps:$4 sm:$0xff]  }
  0x7d   :  { %843 = vmatpush1.bf16.msra.mxu1 %v2726_v44  ;;  %864 = vmatpush1.bf16.msra.mxu0 %v2729_v45  ;;  %v2823_v44 = vld [vmem:[#allocation4 + $0x1a4] ss:$8 sps:$4 sm:$0xff]   ;;  %v2821_v45 = vld [vmem:[#allocation4 + $0x1a0] ss:$8 sps:$4 sm:$0xff]  }
  0x7e   :  { %844 = vmatprep.subr.bf16.mxu1 %v2734_v46  ;;  %865 = vmatprep.subr.bf16.mxu0 %v2737_v47  ;;  %v2826_v46 = vld [vmem:[#allocation4 + $0x1b4] ss:$8 sps:$4 sm:$0xff]   ;;  %v2824_v47 = vld [vmem:[#allocation4 + $0x1b0] ss:$8 sps:$4 sm:$0xff]  }
  0x81   :  { %845 = vmatpush1.bf16.msra.mxu1 %v2732_v50  ;;  %866 = vmatpush1.bf16.msra.mxu0 %v2735_v51  ;;  %v2827_v50 = vld [vmem:[#allocation4 + $0x1c0] ss:$8 sps:$4 sm:$0xff]   ;;  %v2832_v51 = vld [vmem:[#allocation4 + $0x1d4] ss:$8 sps:$4 sm:$0xff]  }
  0x82   :  { %846 = vmatprep.subr.bf16.mxu1 %v2740_v52  ;;  %867 = vmatprep.subr.bf16.mxu0 %v732_v53  ;;  %v2830_v52 = vld [vmem:[#allocation4 + $0x1d0] ss:$8 sps:$4 sm:$0xff]   ;;  %v2833_v53 = vld [vmem:[#allocation4 + $0x1e0] ss:$8 sps:$4 sm:$0xff]  }
  0x85   :  { %847 = vmatpush1.bf16.msra.mxu1 %v2738_v54  ;;  %868 = vmatpush1.bf16.msra.mxu0 %v729_v55  ;;  %v2838_v54 = vld [vmem:[#allocation4 + $0x1f4] ss:$8 sps:$4 sm:$0xff]   ;;  %v2836_v55 = vld [vmem:[#allocation4 + $0x1f0] ss:$8 sps:$4 sm:$0xff]  }
  0x86   :  { %1137 = vmatprep.subr.bf16.mxu0 %v2745_v57  ;;  %1386 = vmatprep.subr.bf16.mxu1 %v2766_v4  ;;  %v2862_v57 = vld [vmem:[#allocation4 + $0x304] ss:$8 sps:$4 sm:$0xff]  }
  0x88   :  { %849 = vmatmul.mubr.bf16.vlgmr.msra.gmra.mrb[8].mxu1 %v58_v31  ;;  %2385 = vmatmul.mubr.msk.bf16.vlgmr.msra.gmra.mrb[8].mxu0 %vm714_vm4, %v3122_v49  ;;  %v2758_v49 = vld [vmem:[#allocation4 + $0x50] ss:$8 sps:$4 sm:$0xff]   ;;  %v2805_v31 = vld [vmem:[#allocation4 + $0xd4] ss:$8 sps:$4 sm:$0xff]  }
  0x89   :  { %1138 = vmatpush1.bf16.msra.mxu0 %v2743_v56  ;;  %1387 = vmatpush1.bf16.msra.mxu1 %v2764_v3  ;;  %v2841_v56 = vld [vmem:[#allocation4 + $0x204] ss:$8 sps:$4 sm:$0xff]  }
  0x8a   :  { %1139 = vmatprep.subr.bf16.mxu0 %v2748_v58  ;;  %1388 = vmatprep.subr.bf16.mxu1 %v2772_v5  ;;  %v900_v5 = vlaneseq }
  0x8d   :  { %1140 = vmatpush1.bf16.msra.mxu0 %v2746_v59  ;;  %1389 = vmatpush1.bf16.msra.mxu1 %v2770_v7 }
  0x8e   :  { %1141 = vmatprep.subr.bf16.mxu0 %v2751_v60  ;;  %1390 = vmatprep.subr.bf16.mxu1 %v2778_v8  ;;  %v898_v8 = vld [vmem:[%s3274_s6] ss:$4 sm:$0xf] }
  0x91   :  { %1142 = vmatpush1.bf16.msra.mxu0 %v2749_v61  ;;  %1391 = vmatpush1.bf16.msra.mxu1 %v2776_v12 }
  0x92   :  { %1143 = vmatprep.subr.bf16.mxu0 %v2754_v37  ;;  %1392 = vmatprep.subr.bf16.mxu1 %v2784_v14 }
  0x95   :  { %1144 = vmatpush1.bf16.msra.mxu0 %v2752_v62  ;;  %1393 = vmatpush1.bf16.msra.mxu1 %v2782_v15 }
  0x96   :  { %1145 = vmatprep.subr.bf16.mxu0 %v2757_v1  ;;  %1394 = vmatprep.subr.bf16.mxu1 %v2790_v16 }
  0x99   :  { %1146 = vmatpush1.bf16.msra.mxu0 %v2755_v63  ;;  %1395 = vmatpush1.bf16.msra.mxu1 %v2788_v19 }
  0x9a   :  { %1147 = vmatprep.subr.bf16.mxu0 %v2760_v2  ;;  %1396 = vmatprep.subr.bf16.mxu1 %v2796_v20 }
  0x9d   :  { %1148 = vmatpush1.bf16.msra.mxu0 %v2758_v49  ;;  %1397 = vmatpush1.bf16.msra.mxu1 %v2794_v23 }
  0x9e   :  { %1149 = vmatprep.subr.bf16.mxu0 %v2763_v6  ;;  %1398 = vmatprep.subr.bf16.mxu1 %v2802_v24  ;;  %v901_v6 = vshrl.u32 %v900_v5, 7  ;;  %v2872_v5 = vld [vmem:[#allocation4 + $0x320] ss:$8 sps:$4 sm:$0xff]  }
  0xa0   :  { %v3137_v7 = vsub.s32 0, %v901_v6 }
  0xa1   :  { %1150 = vmatpush1.bf16.msra.mxu0 %v2761_v9  ;;  %1399 = vmatpush1.bf16.msra.mxu1 %v2800_v27  ;;  %v3142_v9 = vsub.s32 1, %v901_v6  ;;  %v2844_v27 = vld [vmem:[#allocation4 + $0x214] ss:$8 sps:$4 sm:$0xff]  }
  0xa2   :  { %1151 = vmatprep.subr.bf16.mxu0 %v2769_v10  ;;  %1400 = vmatprep.subr.bf16.mxu1 %v2808_v32  ;;  %v903_v12 = vrot.slane %v898_v8, %v3137_v7  ;;  %v910_v32 = vsub.s32 2, %v901_v6 }
  0xa3   :  { %v907_v15 = vrot.slane %v898_v8, %v3142_v9 }
  0xa5   :  { %1152 = vmatpush1.bf16.msra.mxu0 %v2767_v11  ;;  %1401 = vmatpush1.bf16.msra.mxu1 %v2806_v34  ;;  %v2848_v34 = vld [vmem:[#allocation4 + $0x230] ss:$8 sps:$4 sm:$0xff]  }
  0xa6   :  { %1153 = vmatprep.subr.bf16.mxu0 %v2775_v13  ;;  %1402 = vmatprep.subr.bf16.mxu1 %v2814_v36 }
  0xa9   :  { %1154 = vmatpush1.bf16.msra.mxu0 %v2773_v17  ;;  %1403 = vmatpush1.bf16.msra.mxu1 %v2812_v39 }
  0xaa   :  { %1155 = vmatprep.subr.bf16.mxu0 %v2781_v18  ;;  %1404 = vmatprep.subr.bf16.mxu1 %v2820_v41 }
  0xad   :  { %1156 = vmatpush1.bf16.msra.mxu0 %v2779_v21  ;;  %1405 = vmatpush1.bf16.msra.mxu1 %v2818_v43 }
  0xae   :  { %1157 = vmatprep.subr.bf16.mxu0 %v2787_v22  ;;  %1406 = vmatprep.subr.bf16.mxu1 %v2823_v44 }
  0xb1   :  { %1158 = vmatpush1.bf16.msra.mxu0 %v2785_v25  ;;  %1407 = vmatpush1.bf16.msra.mxu1 %v2821_v45  ;;  %v2839_v25 = vld [vmem:[#allocation4 + $0x200] ss:$8 sps:$4 sm:$0xff]  }
  0xb2   :  { %1159 = vmatprep.subr.bf16.mxu0 %v2793_v26  ;;  %1408 = vmatprep.subr.bf16.mxu1 %v2826_v46 }
  0xb5   :  { %1160 = vmatpush1.bf16.msra.mxu0 %v2791_v28  ;;  %1409 = vmatpush1.bf16.msra.mxu1 %v2824_v47  ;;  %v2842_v28 = vld [vmem:[#allocation4 + $0x210] ss:$8 sps:$4 sm:$0xff]   ;;  %v2851_v47 = vld [vmem:[#allocation4 + $0x240] ss:$8 sps:$4 sm:$0xff]  }
  0xb6   :  { %1161 = vmatprep.subr.bf16.mxu0 %v2799_v29  ;;  %1410 = vmatprep.subr.bf16.mxu1 %v2829_v48  ;;  %v2847_v29 = vld [vmem:[#allocation4 + $0x224] ss:$8 sps:$4 sm:$0xff]  }
  0xb9   :  { %1162 = vmatpush1.bf16.msra.mxu0 %v2797_v30  ;;  %1411 = vmatpush1.bf16.msra.mxu1 %v2827_v50  ;;  %v2845_v30 = vld [vmem:[#allocation4 + $0x220] ss:$8 sps:$4 sm:$0xff]  }
  0xba   :  { %1163 = vmatprep.subr.bf16.mxu0 %v2805_v31  ;;  %1412 = vmatprep.subr.bf16.mxu1 %v2832_v51  ;;  %v2850_v31 = vld [vmem:[#allocation4 + $0x234] ss:$8 sps:$4 sm:$0xff]  }
  0xbd   :  { %1164 = vmatpush1.bf16.msra.mxu0 %v2803_v33  ;;  %1413 = vmatpush1.bf16.msra.mxu1 %v2830_v52  ;;  %v914_v33 = vsub.s32 3, %v901_v6  ;;  %v2856_v52 = vld [vmem:[#allocation4 + $0x254] ss:$8 sps:$4 sm:$0xff]  }
  0xbe   :  { %1165 = vmatprep.subr.bf16.mxu0 %v2811_v35  ;;  %1414 = vmatprep.subr.bf16.mxu1 %v2835_v0  ;;  %v2853_v35 = vld [vmem:[#allocation4 + $0x244] ss:$8 sps:$4 sm:$0xff]   ;;  %v2877_v6 = vld [vmem:[#allocation4 + $0x294] ss:$8 sps:$4 sm:$0xff]  }
  0xbf   :  { %v915_v44 = vrot.slane %v898_v8, %v914_v33  ;;  %v2916_v33 = vld [vmem:[#allocation4 + $0x394] ss:$8 sps:$4 sm:$0xff]  }
  0xc1   :  { %1166 = vmatpush1.bf16.msra.mxu0 %v2809_v38  ;;  %1415 = vmatpush1.bf16.msra.mxu1 %v2833_v53 }
  0xc2   :  { %1167 = vmatprep.subr.bf16.mxu0 %v2817_v40  ;;  %1416 = vmatprep.subr.bf16.mxu1 %v2838_v54  ;;  %v911_v40 = vrot.slane %v898_v8, %v910_v32  ;;  %v2880_v8 = vld [vmem:[#allocation4 + $0x334] ss:$8 sps:$4 sm:$0xff]  }
  0xc3   :  { %v2913_v32 = vld [vmem:[#allocation4 + $0x2f4] ss:$8 sps:$4 sm:$0xff]  }
  0xc5   :  { %1168 = vmatpush1.bf16.msra.mxu0 %v2815_v42  ;;  %1417 = vmatpush1.bf16.msra.mxu1 %v2836_v55  ;;  %v2854_v55 = vld [vmem:[#allocation4 + $0x250] ss:$8 sps:$4 sm:$0xff]  }
  0xc6   :  { %1637 = vmatprep.subr.bf16.mxu0 %v2841_v56  ;;  %1888 = vmatprep.subr.bf16.mxu1 %v2862_v57  ;;  %v2859_v57 = vld [vmem:[#allocation4 + $0x264] ss:$8 sps:$4 sm:$0xff]  }
 0x103   :  { %v236_v58 = vpop.f32.mrb[0].mxu0  ;;  %v277_v59 = vpop.f32.mrb[0].mxu1 }
 0x104   :  { %v238_v60 = vpop.f32.mrb[1].mxu0  ;;  %v279_v61 = vpop.f32.mrb[1].mxu1 }
 0x105   :  { %v240_v37 = vpop.f32.mrb[2].mxu0  ;;  %v281_v62 = vpop.f32.mrb[2].mxu1 }
 0x106   :  { %v241_v63 = vpop.f32.mrb[3].mxu0  ;;  %v282_v1 = vpop.f32.mrb[3].mxu1  ;;  %v2865_v62 = vld [vmem:[#allocation4 + $0x274] ss:$8 sps:$4 sm:$0xff]  }
 0x107   :  { %v2868_v63 = vld [vmem:[#allocation4 + $0x314] ss:$8 sps:$4 sm:$0xff]   ;;  %v2863_v1 = vld [vmem:[#allocation4 + $0x270] ss:$8 sps:$4 sm:$0xff]  }
 0x11b   :  { %v809_v2 = vpop.f32.mrb[4].mxu1 }
 0x11c   :  { %v811_v3 = vpop.f32.mrb[5].mxu1 }
 0x11d   :  { %v813_v4 = vpop.f32.mrb[6].mxu1 }
 0x11e   :  { %v814_v49 = vpop.f32.mrb[7].mxu1  ;;  %v2874_v4 = vld [vmem:[#allocation4 + $0x324] ss:$8 sps:$4 sm:$0xff]  }
 0x11f   :  { %v2869_v49 = vld [vmem:[#allocation4 + $0x280] ss:$8 sps:$4 sm:$0xff]  }
 0x143   :  { %v768_v10 = vpop.f32.mrb[4].mxu0 }
 0x144   :  { %v769_v11 = vadd.f32 %v768_v10, %v236_v58  ;;  %v770_v13 = vpop.f32.mrb[5].mxu0  ;;  %v2875_v10 = vld [vmem:[#allocation4 + $0x290] ss:$8 sps:$4 sm:$0xff]  }
 0x145   :  { %v771_v14 = vadd.f32 %v770_v13, %v238_v60  ;;  %v772_v16 = vpop.f32.mrb[6].mxu0  ;;  %v2857_v60 = vld [vmem:[#allocation4 + $0x260] ss:$8 sps:$4 sm:$0xff]   ;;  %v2886_v13 = vld [vmem:[#allocation4 + $0x344] ss:$8 sps:$4 sm:$0xff]  }
 0x146   :  { %v810_v17 = vadd.f32 %v809_v2, %v769_v11  ;;  %v773_v18 = vpop.f32.mrb[7].mxu0  ;;  %v2866_v2 = vld [vmem:[#allocation4 + $0x310] ss:$8 sps:$4 sm:$0xff]   ;;  %v2889_v16 = vld [vmem:[#allocation4 + $0x2b4] ss:$8 sps:$4 sm:$0xff]  }
 0x147   :  { %v812_v19 = vadd.f32 %v811_v3, %v771_v14  ;;  %v2871_v3 = vld [vmem:[#allocation4 + $0x284] ss:$8 sps:$4 sm:$0xff]   ;;  %v2878_v11 = vld [vmem:[#allocation4 + $0x330] ss:$8 sps:$4 sm:$0xff]   ;;  %v2881_v14 = vld [vmem:[#allocation4 + $0x2a0] ss:$8 sps:$4 sm:$0xff]  }
 0x148   :  { %v920_v20 = vadd.f32 %v903_v12, %v810_v17  ;;  %v2883_v12 = vld [vmem:[#allocation4 + $0x2a4] ss:$8 sps:$4 sm:$0xff]   ;;  %v2892_v17 = vld [vmem:[#allocation4 + $0x354] ss:$8 sps:$4 sm:$0xff]   ;;  %v2887_v18 = vld [vmem:[#allocation4 + $0x2b0] ss:$8 sps:$4 sm:$0xff]  }
 0x149   :  { %v921_v21 = vadd.f32 %v907_v15, %v812_v19  ;;  %v2884_v15 = vld [vmem:[#allocation4 + $0x340] ss:$8 sps:$4 sm:$0xff]   ;;  %v2890_v19 = vld [vmem:[#allocation4 + $0x350] ss:$8 sps:$4 sm:$0xff]  }
 0x14a   :  { %v924_v22 = vmax.f32 %v920_v20, 0.0  ;;  %v2895_v20 = vld [vmem:[#allocation4 + $0x2c4] ss:$8 sps:$4 sm:$0xff]  }
 0x14b   :  { %v925_v23 = vmax.f32 %v921_v21, 0.0  ;;  %v2898_v21 = vld [vmem:[#allocation4 + $0x364] ss:$8 sps:$4 sm:$0xff]  }
 0x14c   :  { %v928_v26 = vpack.c.bf16 %v924_v22, %v924_v22  ;;  %v2893_v22 = vld [vmem:[#allocation4 + $0x2c0] ss:$8 sps:$4 sm:$0xff]  }
 0x14d   :  { %v929_v24 = vpack.c.bf16 %v925_v23, %v925_v23  ;;  %v2896_v23 = vld [vmem:[#allocation4 + $0x360] ss:$8 sps:$4 sm:$0xff]  }
 0x14f   :  { %1169 = vmatprep.mubr.bf16.mxu0 %v929_v24  ;;  %v2901_v24 = vld [vmem:[#allocation4 + $0x2d4] ss:$8 sps:$4 sm:$0xff]  }
 0x150   :  { %1170 = vmatmul.mubr.bf16.vlgmr.msra.gmra.mrb[12].mxu0 %v928_v26  ;;  %v2899_v26 = vld [vmem:[#allocation4 + $0x2d0] ss:$8 sps:$4 sm:$0xff]  }
 0x151   :  { %1638 = vmatpush1.bf16.msra.mxu0 %v2839_v25  ;;  %v2904_v25 = vld [vmem:[#allocation4 + $0x374] ss:$8 sps:$4 sm:$0xff]  }
 0x152   :  { %1639 = vmatprep.subr.bf16.mxu0 %v2844_v27  ;;  %v2902_v27 = vld [vmem:[#allocation4 + $0x370] ss:$8 sps:$4 sm:$0xff]  }
 0x155   :  { %1640 = vmatpush1.bf16.msra.mxu0 %v2842_v28  ;;  %v2907_v28 = vld [vmem:[#allocation4 + $0x2e4] ss:$8 sps:$4 sm:$0xff]  }
 0x156   :  { %1641 = vmatprep.subr.bf16.mxu0 %v2847_v29  ;;  %v2910_v29 = vld [vmem:[#allocation4 + $0x384] ss:$8 sps:$4 sm:$0xff]  }
 0x159   :  { %1642 = vmatpush1.bf16.msra.mxu0 %v2845_v30  ;;  %v2905_v30 = vld [vmem:[#allocation4 + $0x2e0] ss:$8 sps:$4 sm:$0xff]  }
 0x15a   :  { %1643 = vmatprep.subr.bf16.mxu0 %v2850_v31  ;;  %v2908_v31 = vld [vmem:[#allocation4 + $0x380] ss:$8 sps:$4 sm:$0xff]  }
 0x15b   :  { %v850_v36 = vpop.f32.mrb[8].mxu1  ;;  %v891_v38 = vpop.f32.mrb[8].mxu0 }
 0x15c   :  { %v851_v39 = vadd.f32 %v850_v36, %v277_v59  ;;  %v852_v41 = vpop.f32.mrb[9].mxu1  ;;  %v893_v42 = vpop.f32.mrb[9].mxu0  ;;  %v2919_v36 = vld [vmem:[#allocation4 + $0x3a4] ss:$8 sps:$4 sm:$0xff]  }
 0x15d   :  { %v853_v43 = vadd.f32 %v852_v41, %v279_v61  ;;  %v854_v45 = vpop.f32.mrb[10].mxu1  ;;  %v895_v46 = vpop.f32.mrb[10].mxu0  ;;  %1644 = vmatpush1.bf16.msra.mxu0 %v2848_v34  ;;  %v2860_v61 = vld [vmem:[#allocation4 + $0x300] ss:$8 sps:$4 sm:$0xff]   ;;  %v2911_v34 = vld [vmem:[#allocation4 + $0x2f0] ss:$8 sps:$4 sm:$0xff]  }
 0x15e   :  { %v892_v48 = vadd.f32 %v891_v38, %v851_v39  ;;  %v855_v50 = vpop.f32.mrb[11].mxu1  ;;  %v896_v51 = vpop.f32.mrb[11].mxu0  ;;  %1645 = vmatprep.subr.bf16.mxu0 %v2853_v35  ;;  %v2914_v35 = vld [vmem:[#allocation4 + $0x390] ss:$8 sps:$4 sm:$0xff]   ;;  %v2917_v38 = vld [vmem:[#allocation4 + $0x3a0] ss:$8 sps:$4 sm:$0xff]  }
 0x15f   :  { %v894_v0 = vadd.f32 %v893_v42, %v853_v43  ;;  %v2922_v39 = vld [vmem:[#allocation4 + $0x3b4] ss:$8 sps:$4 sm:$0xff]   ;;  %v2925_v41 = vld [vmem:[#allocation4 + $0x3c4] ss:$8 sps:$4 sm:$0xff]   ;;  %v2923_v42 = vld [vmem:[#allocation4 + $0x3c0] ss:$8 sps:$4 sm:$0xff]  }
 0x160   :  { %v922_v53 = vadd.f32 %v911_v40, %v892_v48  ;;  %v2920_v40 = vld [vmem:[#allocation4 + $0x3b0] ss:$8 sps:$4 sm:$0xff]   ;;  %v2928_v43 = vld [vmem:[#allocation4 + $0x3d4] ss:$8 sps:$4 sm:$0xff]   ;;  %v2931_v45 = vld [vmem:[#allocation4 + $0x3e4] ss:$8 sps:$4 sm:$0xff]  }
 0x161   :  { %v923_v54 = vadd.f32 %v915_v44, %v894_v0  ;;  %1646 = vmatpush1.bf16.msra.mxu0 %v2851_v47  ;;  %v2926_v44 = vld [vmem:[#allocation4 + $0x3d0] ss:$8 sps:$4 sm:$0xff]   ;;  %v2929_v46 = vld [vmem:[#allocation4 + $0x3e0] ss:$8 sps:$4 sm:$0xff]   ;;  %v2934_v47 = vld [vmem:[#allocation4 + $0x3f4] ss:$8 sps:$4 sm:$0xff]  }
 0x162   :  { %v926_v56 = vmax.f32 %v922_v53, 0.0  ;;  %1647 = vmatprep.subr.bf16.mxu0 %v2856_v52  ;;  %v2932_v48 = vld [vmem:[#allocation4 + $0x3f0] ss:$8 sps:$4 sm:$0xff]  }
 0x163   :  { %v927_v58 = vmax.f32 %v923_v54, 0.0  ;;  %v2935_v50 = vld [vmem:[%s3273_s5 + $0x40] sm:$0xff]  }
 0x164   :  { %v930_v37 = vpack.c.bf16 %v926_v56, %v926_v56  ;;  %v2386_v51 = vld [vmem:[%s3274_s6 + $0x1] ss:$4 sm:$0x3] }
 0x165   :  { %v931_v59 = vpack.c.bf16 %v927_v58, %v927_v58  ;;  %1648 = vmatpush1.bf16.msra.mxu0 %v2854_v55  ;;  %v970_v52 = vrot.slane %v2386_v51, %v3137_v7  ;;  %v974_v0 = vrot.slane %v2386_v51, %v3142_v9 }
 0x166   :  { %1649 = vmatprep.subr.bf16.mxu0 %v2859_v57 }
 0x167   :  { %1418 = vmatprep.mubr.bf16.mxu1 %v931_v59 }
 0x168   :  { %1419 = vmatmul.mubr.bf16.vlgmr.msra.gmra.mrb[12].mxu1 %v930_v37  ;;  %v2936_v37 = vld [vmem:[%s3273_s5] sm:$0xff]  }
 0x169   :  { %1650 = vmatpush1.bf16.msra.mxu0 %v2857_v60  ;;  %1889 = vmatpush1.bf16.msra.mxu1 %v2860_v61 }
 0x16a   :  { %1651 = vmatprep.subr.bf16.mxu0 %v2865_v62  ;;  %1890 = vmatprep.subr.bf16.mxu1 %v2868_v63  ;;  %v2937_v63 = vld [vmem:[%s3273_s5 + $0x48] sm:$0xff]  }
 0x16d   :  { %1652 = vmatpush1.bf16.msra.mxu0 %v2863_v1  ;;  %1891 = vmatpush1.bf16.msra.mxu1 %v2866_v2  ;;  %v2938_v1 = vld [vmem:[%s3273_s5 + $0x8] sm:$0xff]   ;;  %v2939_v2 = vld [vmem:[%s3273_s5 + $0x50] sm:$0xff]  }
 0x16e   :  { %1653 = vmatprep.subr.bf16.mxu0 %v2871_v3  ;;  %1892 = vmatprep.subr.bf16.mxu1 %v2874_v4  ;;  %v2940_v3 = vld [vmem:[%s3273_s5 + $0x10] sm:$0xff]   ;;  %v2941_v4 = vld [vmem:[%s3273_s5 + $0x58] sm:$0xff]  }
 0x171   :  { %1654 = vmatpush1.bf16.msra.mxu0 %v2869_v49  ;;  %1893 = vmatpush1.bf16.msra.mxu1 %v2872_v5  ;;  %v2419_v49 = vld [vmem:[%s3274_s6 + $0x9] ss:$4 sm:$0x3]  ;;  %v2942_v5 = vld [vmem:[%s3273_s5 + $0x18] sm:$0xff]  }
 0x172   :  { %1655 = vmatprep.subr.bf16.mxu0 %v2877_v6  ;;  %1894 = vmatprep.subr.bf16.mxu1 %v2880_v8  ;;  %v2943_v6 = vld [vmem:[%s3273_s5 + $0x60] sm:$0xff]   ;;  %v1219_v8 = vrot.slane %v2419_v49, %v3137_v7 }
 0x175   :  { %1656 = vmatpush1.bf16.msra.mxu0 %v2875_v10  ;;  %1895 = vmatpush1.bf16.msra.mxu1 %v2878_v11  ;;  %v1223_v10 = vrot.slane %v2419_v49, %v3142_v9  ;;  %v2944_v11 = vld [vmem:[%s3273_s5 + $0x20] sm:$0xff]  }
 0x176   :  { %1657 = vmatprep.subr.bf16.mxu0 %v2883_v12  ;;  %1896 = vmatprep.subr.bf16.mxu1 %v2886_v13  ;;  %v2945_v12 = vld [vmem:[%s3273_s5 + $0x68] sm:$0xff]  }
 0x179   :  { %1658 = vmatpush1.bf16.msra.mxu0 %v2881_v14  ;;  %1897 = vmatpush1.bf16.msra.mxu1 %v2884_v15 }
 0x17a   :  { %1659 = vmatprep.subr.bf16.mxu0 %v2889_v16  ;;  %1898 = vmatprep.subr.bf16.mxu1 %v2892_v17 }
 0x17d   :  { %1660 = vmatpush1.bf16.msra.mxu0 %v2887_v18  ;;  %1899 = vmatpush1.bf16.msra.mxu1 %v2890_v19  ;;  %v2946_v18 = vld [vmem:[%s3273_s5 + $0x28] sm:$0xff]  }
 0x17e   :  { %1661 = vmatprep.subr.bf16.mxu0 %v2895_v20  ;;  %1900 = vmatprep.subr.bf16.mxu1 %v2898_v21 }
 0x181   :  { %1662 = vmatpush1.bf16.msra.mxu0 %v2893_v22  ;;  %1901 = vmatpush1.bf16.msra.mxu1 %v2896_v23 }
 0x182   :  { %1663 = vmatprep.subr.bf16.mxu0 %v2901_v24  ;;  %1902 = vmatprep.subr.bf16.mxu1 %v2904_v25  ;;  %v2947_v24 = vld [vmem:[%s3273_s5 + $0x70] sm:$0xff]   ;;  %v2948_v25 = vld [vmem:[%s3273_s5 + $0xc0] sm:$0xff]  }
 0x185   :  { %1664 = vmatpush1.bf16.msra.mxu0 %v2899_v26  ;;  %1903 = vmatpush1.bf16.msra.mxu1 %v2902_v27  ;;  %v2949_v26 = vld [vmem:[%s3273_s5 + $0x30] sm:$0xff]   ;;  %v2950_v27 = vld [vmem:[%s3273_s5 + $0x80] sm:$0xff]  }
 0x186   :  { %1665 = vmatprep.subr.bf16.mxu0 %v2907_v28  ;;  %1904 = vmatprep.subr.bf16.mxu1 %v2910_v29  ;;  %v2951_v28 = vld [vmem:[%s3273_s5 + $0x78] sm:$0xff]   ;;  %v2952_v29 = vld [vmem:[%s3273_s5 + $0xc8] sm:$0xff]  }
 0x189   :  { %1666 = vmatpush1.bf16.msra.mxu0 %v2905_v30  ;;  %1905 = vmatpush1.bf16.msra.mxu1 %v2908_v31  ;;  %v2953_v30 = vld [vmem:[%s3273_s5 + $0x38] sm:$0xff]   ;;  %v2954_v31 = vld [vmem:[%s3273_s5 + $0x88] sm:$0xff]  }
 0x18a   :  { %1667 = vmatprep.subr.bf16.mxu0 %v2913_v32  ;;  %1906 = vmatprep.subr.bf16.mxu1 %v2916_v33  ;;  %v2955_v32 = vld [vmem:[%s3273_s5 + $0xd0] sm:$0xff]  }
 0x18b   :  { %v2956_v33 = vld [vmem:[%s3273_s5 + $0x90] sm:$0xff]  }
 0x18d   :  { %1668 = vmatpush1.bf16.msra.mxu0 %v2911_v34  ;;  %1907 = vmatpush1.bf16.msra.mxu1 %v2914_v35  ;;  %v2957_v34 = vld [vmem:[%s3273_s5 + $0xd8] sm:$0xff]  }
 0x18e   :  { %1908 = vmatprep.subr.bf16.mxu1 %v2919_v36  ;;  %2551 = vmatprep.subr.bf16.mxu0 %v2935_v50  ;;  %v2958_v35 = vld [vmem:[%s3273_s5 + $0x98] sm:$0xff]   ;;  %v2959_v36 = vld [vmem:[%s3273_s5 + $0xe0] sm:$0xff]  }
 0x191   :  { %1909 = vmatpush1.bf16.msra.mxu1 %v2917_v38  ;;  %v2960_v38 = vld [vmem:[%s3273_s5 + $0xa0] sm:$0xff]  }
 0x192   :  { %1910 = vmatprep.subr.bf16.mxu1 %v2922_v39  ;;  %v2961_v39 = vld [vmem:[%s3273_s5 + $0xe8] sm:$0xff]  }
 0x195   :  { %1911 = vmatpush1.bf16.msra.mxu1 %v2920_v40  ;;  %v2962_v40 = vld [vmem:[%s3273_s5 + $0xa8] sm:$0xff]  }
 0x196   :  { %1912 = vmatprep.subr.bf16.mxu1 %v2925_v41  ;;  %v2963_v41 = vld [vmem:[%s3273_s5 + $0xf0] sm:$0xff]  }
 0x199   :  { %1913 = vmatpush1.bf16.msra.mxu1 %v2923_v42  ;;  %v2964_v42 = vld [vmem:[%s3273_s5 + $0xb0] sm:$0xff]  }
 0x19a   :  { %1914 = vmatprep.subr.bf16.mxu1 %v2928_v43  ;;  %v2965_v43 = vld [vmem:[%s3273_s5 + $0xf8] sm:$0xff]  }
 0x19d   :  { %1915 = vmatpush1.bf16.msra.mxu1 %v2926_v44  ;;  %v2966_v44 = vld [vmem:[%s3273_s5 + $0xb8] sm:$0xff]  }
 0x19e   :  { %1916 = vmatprep.subr.bf16.mxu1 %v2931_v45  ;;  %v2452_v45 = vld [vmem:[%s3274_s6 + $0x2] ss:$4 sm:$0x3] }
 0x1a1   :  { %1917 = vmatpush1.bf16.msra.mxu1 %v2929_v46  ;;  %v1470_v46 = vrot.slane %v2452_v45, %v3137_v7 }
 0x1a2   :  { %1918 = vmatprep.subr.bf16.mxu1 %v2934_v47  ;;  %v1474_v47 = vrot.slane %v2452_v45, %v3142_v9 }
 0x1a5   :  { %1919 = vmatpush1.bf16.msra.mxu1 %v2932_v48 }
 0x1a6   :  { %2573 = vmatprep.subr.bf16.mxu1 %v2948_v25 }
 0x223   :  { %v1171_v53 = vpop.f32.mrb[12].mxu0 }
 0x224   :  { %v1172_v54 = vadd.f32 %v1171_v53, %v970_v52  ;;  %v1173_v55 = vpop.f32.mrb[13].mxu0 }
 0x225   :  { %v1174_v56 = vadd.f32 %v1173_v55, %v974_v0  ;;  %v1175_v57 = vpop.f32.mrb[14].mxu0 }
 0x226   :  { %v1178_v58 = vmax.f32 %v1172_v54, 0.0  ;;  %v1176_v59 = vpop.f32.mrb[15].mxu0 }
 0x227   :  { %v1179_v60 = vmax.f32 %v1174_v56, 0.0 }
 0x228   :  { %v1429_v62 = vpack.c.bf16 %v1178_v58, %v1178_v58  ;;  %v2485_v58 = vld [vmem:[%s3274_s6 + $0xa] ss:$4 sm:$0x3] }
 0x229   :  { %v1430_v61 = vpack.c.bf16 %v1179_v60, %v1179_v60  ;;  %v1721_v59 = vrot.slane %v2485_v58, %v3137_v7  ;;  %v1725_v60 = vrot.slane %v2485_v58, %v3142_v9  ;;  %v2518_v7 = vld [vmem:[%s3274_s6 + $0x3] ss:$0 sm:$0xff] }
 0x22b   :  { %1669 = vmatprep.mubr.bf16.mxu0 %v1430_v61 }
 0x22c   :  { %1670 = vmatmul.mubr.bf16.vlgmr.msra.gmra.mrb[16].mxu0 %v1429_v62 }
 0x22d   :  { %2552 = vmatpush3.bf16.msra.mxu0 %v2936_v37 }
 0x22e   :  { %2553 = vmatprep.subr.bf16.mxu0 %v2937_v63 }
 0x231   :  { %2554 = vmatpush3.bf16.msra.mxu0 %v2938_v1 }
 0x232   :  { %2555 = vmatprep.subr.bf16.mxu0 %v2939_v2 }
 0x235   :  { %2556 = vmatpush3.bf16.msra.mxu0 %v2940_v3 }
 0x236   :  { %2557 = vmatprep.subr.bf16.mxu0 %v2941_v4 }
 0x239   :  { %2558 = vmatpush3.bf16.msra.mxu0 %v2942_v5 }
 0x23a   :  { %2559 = vmatprep.subr.bf16.mxu0 %v2943_v6 }
 0x23b   :  { %v1420_v13 = vpop.f32.mrb[12].mxu1 }
 0x23c   :  { %v1421_v14 = vadd.f32 %v1420_v13, %v1219_v8  ;;  %v1422_v15 = vpop.f32.mrb[13].mxu1 }
 0x23d   :  { %v1423_v16 = vadd.f32 %v1422_v15, %v1223_v10  ;;  %v1424_v17 = vpop.f32.mrb[14].mxu1  ;;  %2560 = vmatpush3.bf16.msra.mxu0 %v2944_v11 }
 0x23e   :  { %v1427_v19 = vmax.f32 %v1421_v14, 0.0  ;;  %v1425_v20 = vpop.f32.mrb[15].mxu1  ;;  %2561 = vmatprep.subr.bf16.mxu0 %v2945_v12 }
 0x23f   :  { %v1428_v21 = vmax.f32 %v1423_v16, 0.0 }
 0x240   :  { %v1680_v23 = vpack.c.bf16 %v1427_v19, %v1427_v19 }
 0x241   :  { %v1681_v22 = vpack.c.bf16 %v1428_v21, %v1428_v21  ;;  %2562 = vmatpush3.bf16.msra.mxu0 %v2946_v18 }
 0x242   :  { %2563 = vmatprep.subr.bf16.mxu0 %v2947_v24 }
 0x243   :  { %1920 = vmatprep.mubr.bf16.mxu1 %v1681_v22 }
 0x244   :  { %1921 = vmatmul.mubr.bf16.vlgmr.msra.gmra.mrb[16].mxu1 %v1680_v23 }
 0x245   :  { %2564 = vmatpush3.bf16.msra.mxu0 %v2949_v26  ;;  %2574 = vmatpush3.bf16.msra.mxu1 %v2950_v27 }
 0x246   :  { %2565 = vmatprep.subr.bf16.mxu0 %v2951_v28  ;;  %2575 = vmatprep.subr.bf16.mxu1 %v2952_v29 }
 0x249   :  { %2566 = vmatpush3.bf16.msra.mxu0 %v2953_v30  ;;  %2576 = vmatpush3.bf16.msra.mxu1 %v2954_v31 }
 0x24a   :  { %2577 = vmatprep.subr.bf16.mxu1 %v2955_v32 }
 0x24d   :  { %2578 = vmatpush3.bf16.msra.mxu1 %v2956_v33 }
 0x24e   :  { %2579 = vmatprep.subr.bf16.mxu1 %v2957_v34 }
 0x251   :  { %2580 = vmatpush3.bf16.msra.mxu1 %v2958_v35 }
 0x252   :  { %2581 = vmatprep.subr.bf16.mxu1 %v2959_v36 }
 0x255   :  { %2582 = vmatpush3.bf16.msra.mxu1 %v2960_v38 }
 0x256   :  { %2583 = vmatprep.subr.bf16.mxu1 %v2961_v39 }
 0x259   :  { %2584 = vmatpush3.bf16.msra.mxu1 %v2962_v40 }
 0x25a   :  { %2585 = vmatprep.subr.bf16.mxu1 %v2963_v41 }
 0x25d   :  { %2586 = vmatpush3.bf16.msra.mxu1 %v2964_v42 }
 0x25e   :  { %2587 = vmatprep.subr.bf16.mxu1 %v2965_v43 }
 0x261   :  { %2588 = vmatpush3.bf16.msra.mxu1 %v2966_v44 }
 0x2ff   :  { %v1671_v48 = vpop.f32.mrb[16].mxu0 }
 0x300   :  { %v1672_v50 = vadd.f32 %v1671_v48, %v1470_v46  ;;  %v1673_v51 = vpop.f32.mrb[17].mxu0 }
 0x301   :  { %v1674_v52 = vadd.f32 %v1673_v51, %v1474_v47  ;;  %v1675_v0 = vpop.f32.mrb[18].mxu0 }
 0x302   :  { %v1678_v53 = vmax.f32 %v1672_v50, 0.0  ;;  %v1676_v54 = vpop.f32.mrb[19].mxu0 }
 0x303   :  { %v1679_v55 = vmax.f32 %v1674_v52, 0.0 }
 0x304   :  { %v1931_v57 = vpack.c.bf16 %v1678_v53, %v1678_v53 }
 0x305   :  { %v1932_v56 = vpack.c.bf16 %v1679_v55, %v1679_v55 }
 0x307   :  { %2228 = vmatprep.mubr.bf16.mxu0 %v1932_v56 }
 0x308   :  { %2229 = vmatmul.mubr.bf16.vlgmr.msra.gmra.mrb[20].mxu0 %v1931_v57 }
 0x317   :  { %v1922_v61 = vpop.f32.mrb[16].mxu1 }
 0x318   :  { %v1923_v37 = vadd.f32 %v1922_v61, %v1721_v59  ;;  %v1924_v62 = vpop.f32.mrb[17].mxu1 }
 0x319   :  { %v1925_v63 = vadd.f32 %v1924_v62, %v1725_v60  ;;  %v1926_v1 = vpop.f32.mrb[18].mxu1 }
 0x31a   :  { %v1929_v2 = vmax.f32 %v1923_v37, 0.0  ;;  %v1927_v3 = vpop.f32.mrb[19].mxu1 }
 0x31b   :  { %v1930_v4 = vmax.f32 %v1925_v63, 0.0 }
 0x31c   :  { %v1933_v5 = vpack.c.bf16 %v1929_v2, %v1929_v2 }
 0x31d   :  { %v1934_v49 = vpack.c.bf16 %v1930_v4, %v1930_v4 }
 0x31f   :  { %2268 = vmatprep.mubr.bf16.mxu1 %v1934_v49 }
 0x320   :  { %2269 = vmatmul.mubr.bf16.vlgmr.msra.gmra.mrb[20].mxu1 %v1933_v5 }
 0x3db   :  { %v2567_v6 = vpop.f32.mrb[20].mxu0 }
 0x3dc   :  { %v2568_v8 = vpop.f32.mrb[21].mxu0 }
 0x3dd   :  { %v2569_v10 = vadd.f32 %v2568_v8, %v2567_v6  ;;  %v2570_v11 = vpop.f32.mrb[22].mxu0 }
 0x3de   :  { %v2571_v12 = vpop.f32.mrb[23].mxu0 }
 0x3df   :  { %v2231_v14 = vadd.f32 %v2569_v10, %v2518_v7 }
 0x3f3   :  { %v2589_v9 = vpop.f32.mrb[20].mxu1 }
 0x3f4   :  { %v2590_v13 = vpop.f32.mrb[21].mxu1 }
 0x3f5   :  { %v2591_v15 = vadd.f32 %v2590_v13, %v2589_v9  ;;  %v2592_v16 = vpop.f32.mrb[22].mxu1 }
 0x3f6   :  { %v2593_v17 = vpop.f32.mrb[23].mxu1 }
 0x3f7   :  { %v2271_v18 = vadd.f32 %v2591_v15, %v2231_v14 }
 0x3f9   :  { %2277 = vst.msk [vmem:[%s3275_s7] sm:$0xff] %vm2276_vm5, %v2271_v18 }
 0x3fa   :  { %2282 = vsyncpa [#allocation3], 1 }
 0x3fb   :  { %2283 = vsyncpa [#allocation5], 1 }

</bundles_post_ra>
